<compile_context>
chip_gen: v7x
topology: tpu7x:2x2x1
jax: 0.10.0
libtpu: 0.0.40
codegen_flags: <defaults>
</compile_context>

<pallas_src>
import functools

import jax
import jax.numpy as jnp
import numpy as np
from jax.experimental import pallas as pl
from jax.experimental.pallas import tpu as pltpu


def _lstm_fc_kernel(num_layers, hidden, seq_len, batch, x_ref, *refs):
    """refs = [wih_0, whh_0, b_0, ..., wih_{L-1}, whh_{L-1}, b_{L-1},
               wfc, bfc, out_ref, hseq_scratch].

    Weights are bf16 (MXU-native); biases, c/h state and all elementwise math
    are f32.  g-gate columns of wih/whh/b were pre-scaled by 2 in the wrapper
    so tanh(z) can be recovered as 2*sigmoid(2z) - 1 from the single sigmoid.
    """
    n_w = 3 * num_layers
    wfc = refs[n_w][...]          # (H, O_pad)  bf16
    bfc = refs[n_w + 1][...]      # (1, O_pad)  f32
    out_ref = refs[n_w + 2]       # (B, O_pad)  f32
    hseq_ref = refs[n_w + 3]      # (T*B, H)    f32 VMEM scratch

    T, B, H = seq_len, batch, hidden

    h = jnp.zeros((B, H), jnp.float32)
    for l in range(num_layers):                      # layers unrolled (static)
        wih = refs[3 * l + 0][...]                   # (in_dim, 4H) bf16
        whh = refs[3 * l + 1][...]                   # (H, 4H)      bf16
        bia = refs[3 * l + 2][...]                   # (1, 4H)      f32

        # Layer input: raw (already bf16) input for layer 0, otherwise the
        # previous layer's hidden sequence.  Single full read (materialized
        # before this layer's hseq stores in program order), one bulk cast.
        if l == 0:
            layer_in = x_ref[...]                             # (T*B, I) bf16
        else:
            layer_in = hseq_ref[...].astype(jnp.bfloat16)     # (T*B, H) bf16

        # One batched MXU projection for the whole sequence; bias folded in so
        # only the small recurrent matmul sits on the serial time chain.
        pre = jnp.dot(layer_in, wih,
                      preferred_element_type=jnp.float32) + bia  # (T*B,4H) f32

        h = jnp.zeros((B, H), jnp.float32)
        c = jnp.zeros((B, H), jnp.float32)
        for t in range(T):            # time loop fully unrolled (T static, small)
            gates = pre[t * B:(t + 1) * B, :] + jnp.dot(
                h.astype(jnp.bfloat16), whh,
                preferred_element_type=jnp.float32)              # (B, 4H) f32
            # Single full-vreg sigmoid (one EUP push); the g-gate's 2x scale is
            # already folded into the weights, so tanh(z) = 2*sigmoid(2z) - 1.
            sig = jax.nn.sigmoid(gates)
            i_g = sig[:, 0 * H:1 * H]
            f_g = sig[:, 1 * H:2 * H]
            g_g = 2.0 * sig[:, 2 * H:3 * H] - 1.0
            o_g = sig[:, 3 * H:4 * H]
            c = f_g * c + i_g * g_g
            h = o_g * jnp.tanh(c)
            if l + 1 < num_layers:                   # feed the next layer
                hseq_ref[t * B:(t + 1) * B, :] = h

    # h is the last layer's hidden state at the final timestep.
    out_ref[...] = (jnp.dot(h.astype(jnp.bfloat16), wfc,
                            preferred_element_type=jnp.float32)
                    + bfc).astype(out_ref.dtype)


def multi_output_lstm(x, params, *, hidden_size, num_layers, output_size):
    """x: (B, T, I) float32, batch_first like the PyTorch module."""
    B, T, I = x.shape
    H = hidden_size
    B_pad = ((B + 7) // 8) * 8                       # full sublane tile
    O_pad = ((output_size + 127) // 128) * 128       # lane-dense output slab

    # time-major, batch-padded, flattened to (T*B_pad, I); bf16 for the MXU.
    x_tm = jnp.transpose(x, (1, 0, 2))
    if B_pad != B:
        x_tm = jnp.pad(x_tm, ((0, 0), (0, B_pad - B), (0, 0)))
    x2d = x_tm.reshape(T * B_pad, I).astype(jnp.bfloat16)

    def scale_g(w):
        # Pre-scale the g-gate columns by 2 (exact in bf16: exponent bump) so
        # the kernel can use tanh(z) = 2*sigmoid(2z) - 1.
        return jnp.concatenate(
            [w[:, :2 * H], 2.0 * w[:, 2 * H:3 * H], w[:, 3 * H:]], axis=1)

    flat_inputs = [x2d]
    for l in range(num_layers):
        flat_inputs += [
            scale_g(params[f"wih_{l}"]).astype(jnp.bfloat16),
            scale_g(params[f"whh_{l}"]).astype(jnp.bfloat16),
            scale_g(params[f"b_{l}"]).astype(jnp.float32),
        ]

    wfc = params["wfc"].astype(jnp.bfloat16)
    bfc = params["bfc"].astype(jnp.float32)
    if O_pad != output_size:
        wfc = jnp.pad(wfc, ((0, 0), (0, O_pad - output_size)))
        bfc = jnp.pad(bfc, ((0, 0), (0, O_pad - output_size)))
    flat_inputs += [wfc, bfc]

    kernel = functools.partial(_lstm_fc_kernel, num_layers, H, T, B_pad)
    vmem_spec = pl.BlockSpec(memory_space=pltpu.MemorySpace.VMEM)

    # Single grid point on purpose: latency-bound on the serial recurrent
    # chain, total VMEM residency <1 MiB, so no grid / no vmem_limit needed.
    out_pad = pl.pallas_call(
        kernel,
        out_shape=jax.ShapeDtypeStruct((B_pad, O_pad), jnp.float32),
        in_specs=[vmem_spec] * len(flat_inputs),
        out_specs=vmem_spec,
        scratch_shapes=[pltpu.VMEM((T * B_pad, H), jnp.float32)],
    )(*flat_inputs)
    return out_pad[:B, :output_size]


def _reference(x, params, *, hidden_size, num_layers, matmul_dtype=jnp.float32):
    """Pure-JAX reference for torch.nn.LSTM(batch_first) + Linear.

    matmul_dtype=bfloat16 mimics the kernel's MXU precision (bf16 operands,
    f32 accumulate) for a tight numerical comparison."""
    B, T, I = x.shape
    H = hidden_size

    def mm(a, b):
        return jnp.dot(a.astype(matmul_dtype), b.astype(matmul_dtype),
                       preferred_element_type=jnp.float32)

    layer_in = x
    for l in range(num_layers):
        wih, whh, b = params[f"wih_{l}"], params[f"whh_{l}"], params[f"b_{l}"]
        h = jnp.zeros((B, H), jnp.float32)
        c = jnp.zeros((B, H), jnp.float32)
        outs = []
        for t in range(T):
            gates = mm(layer_in[:, t, :], wih) + mm(h, whh) + b
            i_g = jax.nn.sigmoid(gates[:, 0 * H:1 * H])
            f_g = jax.nn.sigmoid(gates[:, 1 * H:2 * H])
            g_g = jnp.tanh(gates[:, 2 * H:3 * H])
            o_g = jax.nn.sigmoid(gates[:, 3 * H:4 * H])
            c = f_g * c + i_g * g_g
            h = o_g * jnp.tanh(c)
            outs.append(h)
        layer_in = jnp.stack(outs, axis=1)
    return mm(layer_in[:, -1, :], params["wfc"]) + params["bfc"]


def init_params(key, input_size, hidden_size, num_layers, output_size):
    """Deterministic init matching PyTorch parameter shapes (uniform ±1/sqrt(H))."""
    H = hidden_size
    bound = 1.0 / np.sqrt(H)
    params = {}
    for l in range(num_layers):
        in_dim = input_size if l == 0 else hidden_size
        key, k1, k2, k3, k4 = jax.random.split(key, 5)
        # stored transposed vs torch: (in_dim, 4H) / (H, 4H); gate order (i,f,g,o)
        params[f"wih_{l}"] = jax.random.uniform(k1, (in_dim, 4 * H), jnp.float32, -bound, bound)
        params[f"whh_{l}"] = jax.random.uniform(k2, (H, 4 * H), jnp.float32, -bound, bound)
        b_ih = jax.random.uniform(k3, (4 * H,), jnp.float32, -bound, bound)
        b_hh = jax.random.uniform(k4, (4 * H,), jnp.float32, -bound, bound)
        params[f"b_{l}"] = (b_ih + b_hh).reshape(1, 4 * H)   # combined, kept 2-D for TPU
    key, k1, k2 = jax.random.split(key, 3)
    params["wfc"] = jax.random.uniform(k1, (H, output_size), jnp.float32, -bound, bound)
    params["bfc"] = jax.random.uniform(k2, (1, output_size), jnp.float32, -bound, bound)
    return params


if __name__ == "__main__":
    INPUT_SIZE = 16
    HIDDEN_SIZE = 32
    NUM_LAYERS = 2
    OUTPUT_SIZE = 8
    BATCH = 2
    SEQ = 8

    key = jax.random.PRNGKey(0)
    key, kx = jax.random.split(key)
    x = jax.random.normal(kx, (BATCH, SEQ, INPUT_SIZE), jnp.float32)
    params = init_params(key, INPUT_SIZE, HIDDEN_SIZE, NUM_LAYERS, OUTPUT_SIZE)

    out = multi_output_lstm(x, params,
                            hidden_size=HIDDEN_SIZE,
                            num_layers=NUM_LAYERS,
                            output_size=OUTPUT_SIZE)
    out = jax.block_until_ready(out)

    # Tight check against a reference matching the kernel's bf16-MXU precision.
    ref_bf16 = _reference(x, params, hidden_size=HIDDEN_SIZE,
                          num_layers=NUM_LAYERS, matmul_dtype=jnp.bfloat16)
    np.testing.assert_allclose(np.asarray(out), np.asarray(ref_bf16),
                               rtol=1e-2, atol=1e-2)

    # Looser bound against the pure-f32 PyTorch-semantics reference
    # (difference is purely the declared bf16 matmul precision).
    ref_f32 = _reference(x, params, hidden_size=HIDDEN_SIZE,
                         num_layers=NUM_LAYERS, matmul_dtype=jnp.float32)
    np.testing.assert_allclose(np.asarray(out), np.asarray(ref_f32),
                               rtol=1e-1, atol=1e-1)

    print("KERNEL_OK")
</pallas_src>

<mosaic_0001>
module attributes {stable_mosaic.version = 11 : i64} {
  func.func @_lstm_fc_kernel(%arg0: memref<64x16xbf16, #tpu.memory_space<vmem>>, %arg1: memref<16x128xbf16, #tpu.memory_space<vmem>>, %arg2: memref<32x128xbf16, #tpu.memory_space<vmem>>, %arg3: memref<1x128xf32, #tpu.memory_space<vmem>>, %arg4: memref<32x128xbf16, #tpu.memory_space<vmem>>, %arg5: memref<32x128xbf16, #tpu.memory_space<vmem>>, %arg6: memref<1x128xf32, #tpu.memory_space<vmem>>, %arg7: memref<32x128xbf16, #tpu.memory_space<vmem>>, %arg8: memref<1x128xf32, #tpu.memory_space<vmem>>, %arg9: memref<8x128xf32, #tpu.memory_space<vmem>>, %arg10: memref<64x32xf32, #tpu.memory_space<vmem>>) attributes {dimension_semantics = [], scalar_prefetch = 0 : i64, scratch_operands = 1 : i64, tpu.core_type = #tpu.core_type<tc>} {
    %c0 = arith.constant 0 : index
    %c0_0 = arith.constant 0 : index
    %0 = vector.load %arg7[%c0, %c0_0] : memref<32x128xbf16, #tpu.memory_space<vmem>>, vector<32x128xbf16>
    %c0_1 = arith.constant 0 : index
    %c0_2 = arith.constant 0 : index
    %1 = vector.load %arg8[%c0_1, %c0_2] : memref<1x128xf32, #tpu.memory_space<vmem>>, vector<1x128xf32>
    %c0_3 = arith.constant 0 : index
    %c0_4 = arith.constant 0 : index
    %2 = vector.load %arg1[%c0_3, %c0_4] : memref<16x128xbf16, #tpu.memory_space<vmem>>, vector<16x128xbf16>
    %c0_5 = arith.constant 0 : index
    %c0_6 = arith.constant 0 : index
    %3 = vector.load %arg2[%c0_5, %c0_6] : memref<32x128xbf16, #tpu.memory_space<vmem>>, vector<32x128xbf16>
    %c0_7 = arith.constant 0 : index
    %c0_8 = arith.constant 0 : index
    %4 = vector.load %arg3[%c0_7, %c0_8] : memref<1x128xf32, #tpu.memory_space<vmem>>, vector<1x128xf32>
    %c0_9 = arith.constant 0 : index
    %c0_10 = arith.constant 0 : index
    %5 = vector.load %arg0[%c0_9, %c0_10] : memref<64x16xbf16, #tpu.memory_space<vmem>>, vector<64x16xbf16>
    %cst = arith.constant dense<0.000000e+00> : vector<64x128xf32>
    %6 = tpu.matmul %5, %2, %cst {dimension_numbers = #tpu.dot_dimension_numbers<[1], [0], [0], [1], [0, 0, 1, 1], [], []>} : vector<64x16xbf16>, vector<16x128xbf16>, vector<64x128xf32> -> vector<64x128xf32>
    %7 = vector.broadcast %4 : vector<1x128xf32> to vector<64x128xf32>
    %8 = arith.addf %6, %7 : vector<64x128xf32>
    %cst_11 = arith.constant 0.000000e+00 : f32
    %9 = vector.broadcast %cst_11 : f32 to vector<8x32xf32>
    %cst_12 = arith.constant 0.000000e+00 : f32
    %10 = vector.broadcast %cst_12 : f32 to vector<8x32xf32>
    %11 = vector.extract_strided_slice %8 {offsets = [0, 0], sizes = [8, 128], strides = [1, 1]} : vector<64x128xf32> to vector<8x128xf32>
    %12 = arith.truncf %9 : vector<8x32xf32> to vector<8x32xbf16>
    %cst_13 = arith.constant dense<0.000000e+00> : vector<8x128xf32>
    %13 = tpu.matmul %12, %3, %cst_13 {dimension_numbers = #tpu.dot_dimension_numbers<[1], [0], [0], [1], [0, 0, 1, 1], [], []>} : vector<8x32xbf16>, vector<32x128xbf16>, vector<8x128xf32> -> vector<8x128xf32>
    %14 = arith.addf %11, %13 : vector<8x128xf32>
    %15 = arith.negf %14 : vector<8x128xf32>
    %16 = math.exp %15 : vector<8x128xf32>
    %cst_14 = arith.constant 1.000000e+00 : f32
    %17 = vector.broadcast %cst_14 : f32 to vector<8x128xf32>
    %18 = arith.addf %17, %16 : vector<8x128xf32>
    %19 = arith.divf %17, %18 : vector<8x128xf32>
    %20 = vector.extract_strided_slice %19 {offsets = [0, 0], sizes = [8, 32], strides = [1, 1]} : vector<8x128xf32> to vector<8x32xf32>
    %21 = vector.extract_strided_slice %19 {offsets = [0, 32], sizes = [8, 32], strides = [1, 1]} : vector<8x128xf32> to vector<8x32xf32>
    %22 = vector.extract_strided_slice %19 {offsets = [0, 64], sizes = [8, 32], strides = [1, 1]} : vector<8x128xf32> to vector<8x32xf32>
    %cst_15 = arith.constant 2.000000e+00 : f32
    %23 = vector.broadcast %cst_15 : f32 to vector<8x32xf32>
    %24 = arith.mulf %23, %22 : vector<8x32xf32>
    %cst_16 = arith.constant 1.000000e+00 : f32
    %25 = vector.broadcast %cst_16 : f32 to vector<8x32xf32>
    %26 = arith.subf %24, %25 : vector<8x32xf32>
    %27 = vector.extract_strided_slice %19 {offsets = [0, 96], sizes = [8, 32], strides = [1, 1]} : vector<8x128xf32> to vector<8x32xf32>
    %28 = arith.mulf %21, %10 : vector<8x32xf32>
    %29 = arith.mulf %20, %26 : vector<8x32xf32>
    %30 = arith.addf %28, %29 : vector<8x32xf32>
    %31 = math.tanh %30 : vector<8x32xf32>
    %32 = arith.mulf %27, %31 : vector<8x32xf32>
    %c0_17 = arith.constant 0 : index
    %c0_18 = arith.constant 0 : index
    %33 = vector.load %arg10[%c0_17, %c0_18] : memref<64x32xf32, #tpu.memory_space<vmem>>, vector<8x32xf32>
    tpu.vector_store %arg10[%c0_17, %c0_18], %32 {strides = array<i32>} : memref<64x32xf32, #tpu.memory_space<vmem>>, vector<8x32xf32>,
    %34 = vector.extract_strided_slice %8 {offsets = [8, 0], sizes = [8, 128], strides = [1, 1]} : vector<64x128xf32> to vector<8x128xf32>
    %35 = arith.truncf %32 : vector<8x32xf32> to vector<8x32xbf16>
    %cst_19 = arith.constant dense<0.000000e+00> : vector<8x128xf32>
    %36 = tpu.matmul %35, %3, %cst_19 {dimension_numbers = #tpu.dot_dimension_numbers<[1], [0], [0], [1], [0, 0, 1, 1], [], []>} : vector<8x32xbf16>, vector<32x128xbf16>, vector<8x128xf32> -> vector<8x128xf32>
    %37 = arith.addf %34, %36 : vector<8x128xf32>
    %38 = arith.negf %37 : vector<8x128xf32>
    %39 = math.exp %38 : vector<8x128xf32>
    %cst_20 = arith.constant 1.000000e+00 : f32
    %40 = vector.broadcast %cst_20 : f32 to vector<8x128xf32>
    %41 = arith.addf %40, %39 : vector<8x128xf32>
    %42 = arith.divf %40, %41 : vector<8x128xf32>
    %43 = vector.extract_strided_slice %42 {offsets = [0, 0], sizes = [8, 32], strides = [1, 1]} : vector<8x128xf32> to vector<8x32xf32>
    %44 = vector.extract_strided_slice %42 {offsets = [0, 32], sizes = [8, 32], strides = [1, 1]} : vector<8x128xf32> to vector<8x32xf32>
    %45 = vector.extract_strided_slice %42 {offsets = [0, 64], sizes = [8, 32], strides = [1, 1]} : vector<8x128xf32> to vector<8x32xf32>
    %cst_21 = arith.constant 2.000000e+00 : f32
    %46 = vector.broadcast %cst_21 : f32 to vector<8x32xf32>
    %47 = arith.mulf %46, %45 : vector<8x32xf32>
    %cst_22 = arith.constant 1.000000e+00 : f32
    %48 = vector.broadcast %cst_22 : f32 to vector<8x32xf32>
    %49 = arith.subf %47, %48 : vector<8x32xf32>
    %50 = vector.extract_strided_slice %42 {offsets = [0, 96], sizes = [8, 32], strides = [1, 1]} : vector<8x128xf32> to vector<8x32xf32>
    %51 = arith.mulf %44, %30 : vector<8x32xf32>
    %52 = arith.mulf %43, %49 : vector<8x32xf32>
    %53 = arith.addf %51, %52 : vector<8x32xf32>
    %54 = math.tanh %53 : vector<8x32xf32>
    %55 = arith.mulf %50, %54 : vector<8x32xf32>
    %c8 = arith.constant 8 : index
    %c0_23 = arith.constant 0 : index
    %56 = vector.load %arg10[%c8, %c0_23] : memref<64x32xf32, #tpu.memory_space<vmem>>, vector<8x32xf32>
    tpu.vector_store %arg10[%c8, %c0_23], %55 {strides = array<i32>} : memref<64x32xf32, #tpu.memory_space<vmem>>, vector<8x32xf32>,
    %57 = vector.extract_strided_slice %8 {offsets = [16, 0], sizes = [8, 128], strides = [1, 1]} : vector<64x128xf32> to vector<8x128xf32>
    %58 = arith.truncf %55 : vector<8x32xf32> to vector<8x32xbf16>
    %cst_24 = arith.constant dense<0.000000e+00> : vector<8x128xf32>
    %59 = tpu.matmul %58, %3, %cst_24 {dimension_numbers = #tpu.dot_dimension_numbers<[1], [0], [0], [1], [0, 0, 1, 1], [], []>} : vector<8x32xbf16>, vector<32x128xbf16>, vector<8x128xf32> -> vector<8x128xf32>
    %60 = arith.addf %57, %59 : vector<8x128xf32>
    %61 = arith.negf %60 : vector<8x128xf32>
    %62 = math.exp %61 : vector<8x128xf32>
    %cst_25 = arith.constant 1.000000e+00 : f32
    %63 = vector.broadcast %cst_25 : f32 to vector<8x128xf32>
    %64 = arith.addf %63, %62 : vector<8x128xf32>
    %65 = arith.divf %63, %64 : vector<8x128xf32>
    %66 = vector.extract_strided_slice %65 {offsets = [0, 0], sizes = [8, 32], strides = [1, 1]} : vector<8x128xf32> to vector<8x32xf32>
    %67 = vector.extract_strided_slice %65 {offsets = [0, 32], sizes = [8, 32], strides = [1, 1]} : vector<8x128xf32> to vector<8x32xf32>
    %68 = vector.extract_strided_slice %65 {offsets = [0, 64], sizes = [8, 32], strides = [1, 1]} : vector<8x128xf32> to vector<8x32xf32>
    %cst_26 = arith.constant 2.000000e+00 : f32
    %69 = vector.broadcast %cst_26 : f32 to vector<8x32xf32>
    %70 = arith.mulf %69, %68 : vector<8x32xf32>
    %cst_27 = arith.constant 1.000000e+00 : f32
    %71 = vector.broadcast %cst_27 : f32 to vector<8x32xf32>
    %72 = arith.subf %70, %71 : vector<8x32xf32>
    %73 = vector.extract_strided_slice %65 {offsets = [0, 96], sizes = [8, 32], strides = [1, 1]} : vector<8x128xf32> to vector<8x32xf32>
    %74 = arith.mulf %67, %53 : vector<8x32xf32>
    %75 = arith.mulf %66, %72 : vector<8x32xf32>
    %76 = arith.addf %74, %75 : vector<8x32xf32>
    %77 = math.tanh %76 : vector<8x32xf32>
    %78 = arith.mulf %73, %77 : vector<8x32xf32>
    %c16 = arith.constant 16 : index
    %c0_28 = arith.constant 0 : index
    %79 = vector.load %arg10[%c16, %c0_28] : memref<64x32xf32, #tpu.memory_space<vmem>>, vector<8x32xf32>
    tpu.vector_store %arg10[%c16, %c0_28], %78 {strides = array<i32>} : memref<64x32xf32, #tpu.memory_space<vmem>>, vector<8x32xf32>,
    %80 = vector.extract_strided_slice %8 {offsets = [24, 0], sizes = [8, 128], strides = [1, 1]} : vector<64x128xf32> to vector<8x128xf32>
    %81 = arith.truncf %78 : vector<8x32xf32> to vector<8x32xbf16>
    %cst_29 = arith.constant dense<0.000000e+00> : vector<8x128xf32>
    %82 = tpu.matmul %81, %3, %cst_29 {dimension_numbers = #tpu.dot_dimension_numbers<[1], [0], [0], [1], [0, 0, 1, 1], [], []>} : vector<8x32xbf16>, vector<32x128xbf16>, vector<8x128xf32> -> vector<8x128xf32>
    %83 = arith.addf %80, %82 : vector<8x128xf32>
    %84 = arith.negf %83 : vector<8x128xf32>
    %85 = math.exp %84 : vector<8x128xf32>
    %cst_30 = arith.constant 1.000000e+00 : f32
    %86 = vector.broadcast %cst_30 : f32 to vector<8x128xf32>
    %87 = arith.addf %86, %85 : vector<8x128xf32>
    %88 = arith.divf %86, %87 : vector<8x128xf32>
    %89 = vector.extract_strided_slice %88 {offsets = [0, 0], sizes = [8, 32], strides = [1, 1]} : vector<8x128xf32> to vector<8x32xf32>
    %90 = vector.extract_strided_slice %88 {offsets = [0, 32], sizes = [8, 32], strides = [1, 1]} : vector<8x128xf32> to vector<8x32xf32>
    %91 = vector.extract_strided_slice %88 {offsets = [0, 64], sizes = [8, 32], strides = [1, 1]} : vector<8x128xf32> to vector<8x32xf32>
    %cst_31 = arith.constant 2.000000e+00 : f32
    %92 = vector.broadcast %cst_31 : f32 to vector<8x32xf32>
    %93 = arith.mulf %92, %91 : vector<8x32xf32>
    %cst_32 = arith.constant 1.000000e+00 : f32
    %94 = vector.broadcast %cst_32 : f32 to vector<8x32xf32>
    %95 = arith.subf %93, %94 : vector<8x32xf32>
    %96 = vector.extract_strided_slice %88 {offsets = [0, 96], sizes = [8, 32], strides = [1, 1]} : vector<8x128xf32> to vector<8x32xf32>
    %97 = arith.mulf %90, %76 : vector<8x32xf32>
    %98 = arith.mulf %89, %95 : vector<8x32xf32>
    %99 = arith.addf %97, %98 : vector<8x32xf32>
    %100 = math.tanh %99 : vector<8x32xf32>
    %101 = arith.mulf %96, %100 : vector<8x32xf32>
    %c24 = arith.constant 24 : index
    %c0_33 = arith.constant 0 : index
    %102 = vector.load %arg10[%c24, %c0_33] : memref<64x32xf32, #tpu.memory_space<vmem>>, vector<8x32xf32>
    tpu.vector_store %arg10[%c24, %c0_33], %101 {strides = array<i32>} : memref<64x32xf32, #tpu.memory_space<vmem>>, vector<8x32xf32>,
    %103 = vector.extract_strided_slice %8 {offsets = [32, 0], sizes = [8, 128], strides = [1, 1]} : vector<64x128xf32> to vector<8x128xf32>
    %104 = arith.truncf %101 : vector<8x32xf32> to vector<8x32xbf16>
    %cst_34 = arith.constant dense<0.000000e+00> : vector<8x128xf32>
    %105 = tpu.matmul %104, %3, %cst_34 {dimension_numbers = #tpu.dot_dimension_numbers<[1], [0], [0], [1], [0, 0, 1, 1], [], []>} : vector<8x32xbf16>, vector<32x128xbf16>, vector<8x128xf32> -> vector<8x128xf32>
    %106 = arith.addf %103, %105 : vector<8x128xf32>
    %107 = arith.negf %106 : vector<8x128xf32>
    %108 = math.exp %107 : vector<8x128xf32>
    %cst_35 = arith.constant 1.000000e+00 : f32
    %109 = vector.broadcast %cst_35 : f32 to vector<8x128xf32>
    %110 = arith.addf %109, %108 : vector<8x128xf32>
    %111 = arith.divf %109, %110 : vector<8x128xf32>
    %112 = vector.extract_strided_slice %111 {offsets = [0, 0], sizes = [8, 32], strides = [1, 1]} : vector<8x128xf32> to vector<8x32xf32>
    %113 = vector.extract_strided_slice %111 {offsets = [0, 32], sizes = [8, 32], strides = [1, 1]} : vector<8x128xf32> to vector<8x32xf32>
    %114 = vector.extract_strided_slice %111 {offsets = [0, 64], sizes = [8, 32], strides = [1, 1]} : vector<8x128xf32> to vector<8x32xf32>
    %cst_36 = arith.constant 2.000000e+00 : f32
    %115 = vector.broadcast %cst_36 : f32 to vector<8x32xf32>
    %116 = arith.mulf %115, %114 : vector<8x32xf32>
    %cst_37 = arith.constant 1.000000e+00 : f32
    %117 = vector.broadcast %cst_37 : f32 to vector<8x32xf32>
    %118 = arith.subf %116, %117 : vector<8x32xf32>
    %119 = vector.extract_strided_slice %111 {offsets = [0, 96], sizes = [8, 32], strides = [1, 1]} : vector<8x128xf32> to vector<8x32xf32>
    %120 = arith.mulf %113, %99 : vector<8x32xf32>
    %121 = arith.mulf %112, %118 : vector<8x32xf32>
    %122 = arith.addf %120, %121 : vector<8x32xf32>
    %123 = math.tanh %122 : vector<8x32xf32>
    %124 = arith.mulf %119, %123 : vector<8x32xf32>
    %c32 = arith.constant 32 : index
    %c0_38 = arith.constant 0 : index
    %125 = vector.load %arg10[%c32, %c0_38] : memref<64x32xf32, #tpu.memory_space<vmem>>, vector<8x32xf32>
    tpu.vector_store %arg10[%c32, %c0_38], %124 {strides = array<i32>} : memref<64x32xf32, #tpu.memory_space<vmem>>, vector<8x32xf32>,
    %126 = vector.extract_strided_slice %8 {offsets = [40, 0], sizes = [8, 128], strides = [1, 1]} : vector<64x128xf32> to vector<8x128xf32>
    %127 = arith.truncf %124 : vector<8x32xf32> to vector<8x32xbf16>
    %cst_39 = arith.constant dense<0.000000e+00> : vector<8x128xf32>
    %128 = tpu.matmul %127, %3, %cst_39 {dimension_numbers = #tpu.dot_dimension_numbers<[1], [0], [0], [1], [0, 0, 1, 1], [], []>} : vector<8x32xbf16>, vector<32x128xbf16>, vector<8x128xf32> -> vector<8x128xf32>
    %129 = arith.addf %126, %128 : vector<8x128xf32>
    %130 = arith.negf %129 : vector<8x128xf32>
    %131 = math.exp %130 : vector<8x128xf32>
    %cst_40 = arith.constant 1.000000e+00 : f32
    %132 = vector.broadcast %cst_40 : f32 to vector<8x128xf32>
    %133 = arith.addf %132, %131 : vector<8x128xf32>
    %134 = arith.divf %132, %133 : vector<8x128xf32>
    %135 = vector.extract_strided_slice %134 {offsets = [0, 0], sizes = [8, 32], strides = [1, 1]} : vector<8x128xf32> to vector<8x32xf32>
    %136 = vector.extract_strided_slice %134 {offsets = [0, 32], sizes = [8, 32], strides = [1, 1]} : vector<8x128xf32> to vector<8x32xf32>
    %137 = vector.extract_strided_slice %134 {offsets = [0, 64], sizes = [8, 32], strides = [1, 1]} : vector<8x128xf32> to vector<8x32xf32>
    %cst_41 = arith.constant 2.000000e+00 : f32
    %138 = vector.broadcast %cst_41 : f32 to vector<8x32xf32>
    %139 = arith.mulf %138, %137 : vector<8x32xf32>
    %cst_42 = arith.constant 1.000000e+00 : f32
    %140 = vector.broadcast %cst_42 : f32 to vector<8x32xf32>
    %141 = arith.subf %139, %140 : vector<8x32xf32>
    %142 = vector.extract_strided_slice %134 {offsets = [0, 96], sizes = [8, 32], strides = [1, 1]} : vector<8x128xf32> to vector<8x32xf32>
    %143 = arith.mulf %136, %122 : vector<8x32xf32>
    %144 = arith.mulf %135, %141 : vector<8x32xf32>
    %145 = arith.addf %143, %144 : vector<8x32xf32>
    %146 = math.tanh %145 : vector<8x32xf32>
    %147 = arith.mulf %142, %146 : vector<8x32xf32>
    %c40 = arith.constant 40 : index
    %c0_43 = arith.constant 0 : index
    %148 = vector.load %arg10[%c40, %c0_43] : memref<64x32xf32, #tpu.memory_space<vmem>>, vector<8x32xf32>
    tpu.vector_store %arg10[%c40, %c0_43], %147 {strides = array<i32>} : memref<64x32xf32, #tpu.memory_space<vmem>>, vector<8x32xf32>,
    %149 = vector.extract_strided_slice %8 {offsets = [48, 0], sizes = [8, 128], strides = [1, 1]} : vector<64x128xf32> to vector<8x128xf32>
    %150 = arith.truncf %147 : vector<8x32xf32> to vector<8x32xbf16>
    %cst_44 = arith.constant dense<0.000000e+00> : vector<8x128xf32>
    %151 = tpu.matmul %150, %3, %cst_44 {dimension_numbers = #tpu.dot_dimension_numbers<[1], [0], [0], [1], [0, 0, 1, 1], [], []>} : vector<8x32xbf16>, vector<32x128xbf16>, vector<8x128xf32> -> vector<8x128xf32>
    %152 = arith.addf %149, %151 : vector<8x128xf32>
    %153 = arith.negf %152 : vector<8x128xf32>
    %154 = math.exp %153 : vector<8x128xf32>
    %cst_45 = arith.constant 1.000000e+00 : f32
    %155 = vector.broadcast %cst_45 : f32 to vector<8x128xf32>
    %156 = arith.addf %155, %154 : vector<8x128xf32>
    %157 = arith.divf %155, %156 : vector<8x128xf32>
    %158 = vector.extract_strided_slice %157 {offsets = [0, 0], sizes = [8, 32], strides = [1, 1]} : vector<8x128xf32> to vector<8x32xf32>
    %159 = vector.extract_strided_slice %157 {offsets = [0, 32], sizes = [8, 32], strides = [1, 1]} : vector<8x128xf32> to vector<8x32xf32>
    %160 = vector.extract_strided_slice %157 {offsets = [0, 64], sizes = [8, 32], strides = [1, 1]} : vector<8x128xf32> to vector<8x32xf32>
    %cst_46 = arith.constant 2.000000e+00 : f32
    %161 = vector.broadcast %cst_46 : f32 to vector<8x32xf32>
    %162 = arith.mulf %161, %160 : vector<8x32xf32>
    %cst_47 = arith.constant 1.000000e+00 : f32
    %163 = vector.broadcast %cst_47 : f32 to vector<8x32xf32>
    %164 = arith.subf %162, %163 : vector<8x32xf32>
    %165 = vector.extract_strided_slice %157 {offsets = [0, 96], sizes = [8, 32], strides = [1, 1]} : vector<8x128xf32> to vector<8x32xf32>
    %166 = arith.mulf %159, %145 : vector<8x32xf32>
    %167 = arith.mulf %158, %164 : vector<8x32xf32>
    %168 = arith.addf %166, %167 : vector<8x32xf32>
    %169 = math.tanh %168 : vector<8x32xf32>
    %170 = arith.mulf %165, %169 : vector<8x32xf32>
    %c48 = arith.constant 48 : index
    %c0_48 = arith.constant 0 : index
    %171 = vector.load %arg10[%c48, %c0_48] : memref<64x32xf32, #tpu.memory_space<vmem>>, vector<8x32xf32>
    tpu.vector_store %arg10[%c48, %c0_48], %170 {strides = array<i32>} : memref<64x32xf32, #tpu.memory_space<vmem>>, vector<8x32xf32>,
    %172 = vector.extract_strided_slice %8 {offsets = [56, 0], sizes = [8, 128], strides = [1, 1]} : vector<64x128xf32> to vector<8x128xf32>
    %173 = arith.truncf %170 : vector<8x32xf32> to vector<8x32xbf16>
    %cst_49 = arith.constant dense<0.000000e+00> : vector<8x128xf32>
    %174 = tpu.matmul %173, %3, %cst_49 {dimension_numbers = #tpu.dot_dimension_numbers<[1], [0], [0], [1], [0, 0, 1, 1], [], []>} : vector<8x32xbf16>, vector<32x128xbf16>, vector<8x128xf32> -> vector<8x128xf32>
    %175 = arith.addf %172, %174 : vector<8x128xf32>
    %176 = arith.negf %175 : vector<8x128xf32>
    %177 = math.exp %176 : vector<8x128xf32>
    %cst_50 = arith.constant 1.000000e+00 : f32
    %178 = vector.broadcast %cst_50 : f32 to vector<8x128xf32>
    %179 = arith.addf %178, %177 : vector<8x128xf32>
    %180 = arith.divf %178, %179 : vector<8x128xf32>
    %181 = vector.extract_strided_slice %180 {offsets = [0, 0], sizes = [8, 32], strides = [1, 1]} : vector<8x128xf32> to vector<8x32xf32>
    %182 = vector.extract_strided_slice %180 {offsets = [0, 32], sizes = [8, 32], strides = [1, 1]} : vector<8x128xf32> to vector<8x32xf32>
    %183 = vector.extract_strided_slice %180 {offsets = [0, 64], sizes = [8, 32], strides = [1, 1]} : vector<8x128xf32> to vector<8x32xf32>
    %cst_51 = arith.constant 2.000000e+00 : f32
    %184 = vector.broadcast %cst_51 : f32 to vector<8x32xf32>
    %185 = arith.mulf %184, %183 : vector<8x32xf32>
    %cst_52 = arith.constant 1.000000e+00 : f32
    %186 = vector.broadcast %cst_52 : f32 to vector<8x32xf32>
    %187 = arith.subf %185, %186 : vector<8x32xf32>
    %188 = vector.extract_strided_slice %180 {offsets = [0, 96], sizes = [8, 32], strides = [1, 1]} : vector<8x128xf32> to vector<8x32xf32>
    %189 = arith.mulf %182, %168 : vector<8x32xf32>
    %190 = arith.mulf %181, %187 : vector<8x32xf32>
    %191 = arith.addf %189, %190 : vector<8x32xf32>
    %192 = math.tanh %191 : vector<8x32xf32>
    %193 = arith.mulf %188, %192 : vector<8x32xf32>
    %c56 = arith.constant 56 : index
    %c0_53 = arith.constant 0 : index
    %194 = vector.load %arg10[%c56, %c0_53] : memref<64x32xf32, #tpu.memory_space<vmem>>, vector<8x32xf32>
    tpu.vector_store %arg10[%c56, %c0_53], %193 {strides = array<i32>} : memref<64x32xf32, #tpu.memory_space<vmem>>, vector<8x32xf32>,
    %c0_54 = arith.constant 0 : index
    %c0_55 = arith.constant 0 : index
    %195 = vector.load %arg4[%c0_54, %c0_55] : memref<32x128xbf16, #tpu.memory_space<vmem>>, vector<32x128xbf16>
    %c0_56 = arith.constant 0 : index
    %c0_57 = arith.constant 0 : index
    %196 = vector.load %arg5[%c0_56, %c0_57] : memref<32x128xbf16, #tpu.memory_space<vmem>>, vector<32x128xbf16>
    %c0_58 = arith.constant 0 : index
    %c0_59 = arith.constant 0 : index
    %197 = vector.load %arg6[%c0_58, %c0_59] : memref<1x128xf32, #tpu.memory_space<vmem>>, vector<1x128xf32>
    %c0_60 = arith.constant 0 : index
    %c0_61 = arith.constant 0 : index
    %198 = vector.load %arg10[%c0_60, %c0_61] : memref<64x32xf32, #tpu.memory_space<vmem>>, vector<64x32xf32>
    %199 = arith.truncf %198 : vector<64x32xf32> to vector<64x32xbf16>
    %cst_62 = arith.constant dense<0.000000e+00> : vector<64x128xf32>
    %200 = tpu.matmul %199, %195, %cst_62 {dimension_numbers = #tpu.dot_dimension_numbers<[1], [0], [0], [1], [0, 0, 1, 1], [], []>} : vector<64x32xbf16>, vector<32x128xbf16>, vector<64x128xf32> -> vector<64x128xf32>
    %201 = vector.broadcast %197 : vector<1x128xf32> to vector<64x128xf32>
    %202 = arith.addf %200, %201 : vector<64x128xf32>
    %cst_63 = arith.constant 0.000000e+00 : f32
    %203 = vector.broadcast %cst_63 : f32 to vector<8x32xf32>
    %cst_64 = arith.constant 0.000000e+00 : f32
    %204 = vector.broadcast %cst_64 : f32 to vector<8x32xf32>
    %205 = vector.extract_strided_slice %202 {offsets = [0, 0], sizes = [8, 128], strides = [1, 1]} : vector<64x128xf32> to vector<8x128xf32>
    %206 = arith.truncf %203 : vector<8x32xf32> to vector<8x32xbf16>
    %cst_65 = arith.constant dense<0.000000e+00> : vector<8x128xf32>
    %207 = tpu.matmul %206, %196, %cst_65 {dimension_numbers = #tpu.dot_dimension_numbers<[1], [0], [0], [1], [0, 0, 1, 1], [], []>} : vector<8x32xbf16>, vector<32x128xbf16>, vector<8x128xf32> -> vector<8x128xf32>
    %208 = arith.addf %205, %207 : vector<8x128xf32>
    %209 = arith.negf %208 : vector<8x128xf32>
    %210 = math.exp %209 : vector<8x128xf32>
    %cst_66 = arith.constant 1.000000e+00 : f32
    %211 = vector.broadcast %cst_66 : f32 to vector<8x128xf32>
    %212 = arith.addf %211, %210 : vector<8x128xf32>
    %213 = arith.divf %211, %212 : vector<8x128xf32>
    %214 = vector.extract_strided_slice %213 {offsets = [0, 0], sizes = [8, 32], strides = [1, 1]} : vector<8x128xf32> to vector<8x32xf32>
    %215 = vector.extract_strided_slice %213 {offsets = [0, 32], sizes = [8, 32], strides = [1, 1]} : vector<8x128xf32> to vector<8x32xf32>
    %216 = vector.extract_strided_slice %213 {offsets = [0, 64], sizes = [8, 32], strides = [1, 1]} : vector<8x128xf32> to vector<8x32xf32>
    %cst_67 = arith.constant 2.000000e+00 : f32
    %217 = vector.broadcast %cst_67 : f32 to vector<8x32xf32>
    %218 = arith.mulf %217, %216 : vector<8x32xf32>
    %cst_68 = arith.constant 1.000000e+00 : f32
    %219 = vector.broadcast %cst_68 : f32 to vector<8x32xf32>
    %220 = arith.subf %218, %219 : vector<8x32xf32>
    %221 = vector.extract_strided_slice %213 {offsets = [0, 96], sizes = [8, 32], strides = [1, 1]} : vector<8x128xf32> to vector<8x32xf32>
    %222 = arith.mulf %215, %204 : vector<8x32xf32>
    %223 = arith.mulf %214, %220 : vector<8x32xf32>
    %224 = arith.addf %222, %223 : vector<8x32xf32>
    %225 = math.tanh %224 : vector<8x32xf32>
    %226 = arith.mulf %221, %225 : vector<8x32xf32>
    %227 = vector.extract_strided_slice %202 {offsets = [8, 0], sizes = [8, 128], strides = [1, 1]} : vector<64x128xf32> to vector<8x128xf32>
    %228 = arith.truncf %226 : vector<8x32xf32> to vector<8x32xbf16>
    %cst_69 = arith.constant dense<0.000000e+00> : vector<8x128xf32>
    %229 = tpu.matmul %228, %196, %cst_69 {dimension_numbers = #tpu.dot_dimension_numbers<[1], [0], [0], [1], [0, 0, 1, 1], [], []>} : vector<8x32xbf16>, vector<32x128xbf16>, vector<8x128xf32> -> vector<8x128xf32>
    %230 = arith.addf %227, %229 : vector<8x128xf32>
    %231 = arith.negf %230 : vector<8x128xf32>
    %232 = math.exp %231 : vector<8x128xf32>
    %cst_70 = arith.constant 1.000000e+00 : f32
    %233 = vector.broadcast %cst_70 : f32 to vector<8x128xf32>
    %234 = arith.addf %233, %232 : vector<8x128xf32>
    %235 = arith.divf %233, %234 : vector<8x128xf32>
    %236 = vector.extract_strided_slice %235 {offsets = [0, 0], sizes = [8, 32], strides = [1, 1]} : vector<8x128xf32> to vector<8x32xf32>
    %237 = vector.extract_strided_slice %235 {offsets = [0, 32], sizes = [8, 32], strides = [1, 1]} : vector<8x128xf32> to vector<8x32xf32>
    %238 = vector.extract_strided_slice %235 {offsets = [0, 64], sizes = [8, 32], strides = [1, 1]} : vector<8x128xf32> to vector<8x32xf32>
    %cst_71 = arith.constant 2.000000e+00 : f32
    %239 = vector.broadcast %cst_71 : f32 to vector<8x32xf32>
    %240 = arith.mulf %239, %238 : vector<8x32xf32>
    %cst_72 = arith.constant 1.000000e+00 : f32
    %241 = vector.broadcast %cst_72 : f32 to vector<8x32xf32>
    %242 = arith.subf %240, %241 : vector<8x32xf32>
    %243 = vector.extract_strided_slice %235 {offsets = [0, 96], sizes = [8, 32], strides = [1, 1]} : vector<8x128xf32> to vector<8x32xf32>
    %244 = arith.mulf %237, %224 : vector<8x32xf32>
    %245 = arith.mulf %236, %242 : vector<8x32xf32>
    %246 = arith.addf %244, %245 : vector<8x32xf32>
    %247 = math.tanh %246 : vector<8x32xf32>
    %248 = arith.mulf %243, %247 : vector<8x32xf32>
    %249 = vector.extract_strided_slice %202 {offsets = [16, 0], sizes = [8, 128], strides = [1, 1]} : vector<64x128xf32> to vector<8x128xf32>
    %250 = arith.truncf %248 : vector<8x32xf32> to vector<8x32xbf16>
    %cst_73 = arith.constant dense<0.000000e+00> : vector<8x128xf32>
    %251 = tpu.matmul %250, %196, %cst_73 {dimension_numbers = #tpu.dot_dimension_numbers<[1], [0], [0], [1], [0, 0, 1, 1], [], []>} : vector<8x32xbf16>, vector<32x128xbf16>, vector<8x128xf32> -> vector<8x128xf32>
    %252 = arith.addf %249, %251 : vector<8x128xf32>
    %253 = arith.negf %252 : vector<8x128xf32>
    %254 = math.exp %253 : vector<8x128xf32>
    %cst_74 = arith.constant 1.000000e+00 : f32
    %255 = vector.broadcast %cst_74 : f32 to vector<8x128xf32>
    %256 = arith.addf %255, %254 : vector<8x128xf32>
    %257 = arith.divf %255, %256 : vector<8x128xf32>
    %258 = vector.extract_strided_slice %257 {offsets = [0, 0], sizes = [8, 32], strides = [1, 1]} : vector<8x128xf32> to vector<8x32xf32>
    %259 = vector.extract_strided_slice %257 {offsets = [0, 32], sizes = [8, 32], strides = [1, 1]} : vector<8x128xf32> to vector<8x32xf32>
    %260 = vector.extract_strided_slice %257 {offsets = [0, 64], sizes = [8, 32], strides = [1, 1]} : vector<8x128xf32> to vector<8x32xf32>
    %cst_75 = arith.constant 2.000000e+00 : f32
    %261 = vector.broadcast %cst_75 : f32 to vector<8x32xf32>
    %262 = arith.mulf %261, %260 : vector<8x32xf32>
    %cst_76 = arith.constant 1.000000e+00 : f32
    %263 = vector.broadcast %cst_76 : f32 to vector<8x32xf32>
    %264 = arith.subf %262, %263 : vector<8x32xf32>
    %265 = vector.extract_strided_slice %257 {offsets = [0, 96], sizes = [8, 32], strides = [1, 1]} : vector<8x128xf32> to vector<8x32xf32>
    %266 = arith.mulf %259, %246 : vector<8x32xf32>
    %267 = arith.mulf %258, %264 : vector<8x32xf32>
    %268 = arith.addf %266, %267 : vector<8x32xf32>
    %269 = math.tanh %268 : vector<8x32xf32>
    %270 = arith.mulf %265, %269 : vector<8x32xf32>
    %271 = vector.extract_strided_slice %202 {offsets = [24, 0], sizes = [8, 128], strides = [1, 1]} : vector<64x128xf32> to vector<8x128xf32>
    %272 = arith.truncf %270 : vector<8x32xf32> to vector<8x32xbf16>
    %cst_77 = arith.constant dense<0.000000e+00> : vector<8x128xf32>
    %273 = tpu.matmul %272, %196, %cst_77 {dimension_numbers = #tpu.dot_dimension_numbers<[1], [0], [0], [1], [0, 0, 1, 1], [], []>} : vector<8x32xbf16>, vector<32x128xbf16>, vector<8x128xf32> -> vector<8x128xf32>
    %274 = arith.addf %271, %273 : vector<8x128xf32>
    %275 = arith.negf %274 : vector<8x128xf32>
    %276 = math.exp %275 : vector<8x128xf32>
    %cst_78 = arith.constant 1.000000e+00 : f32
    %277 = vector.broadcast %cst_78 : f32 to vector<8x128xf32>
    %278 = arith.addf %277, %276 : vector<8x128xf32>
    %279 = arith.divf %277, %278 : vector<8x128xf32>
    %280 = vector.extract_strided_slice %279 {offsets = [0, 0], sizes = [8, 32], strides = [1, 1]} : vector<8x128xf32> to vector<8x32xf32>
    %281 = vector.extract_strided_slice %279 {offsets = [0, 32], sizes = [8, 32], strides = [1, 1]} : vector<8x128xf32> to vector<8x32xf32>
    %282 = vector.extract_strided_slice %279 {offsets = [0, 64], sizes = [8, 32], strides = [1, 1]} : vector<8x128xf32> to vector<8x32xf32>
    %cst_79 = arith.constant 2.000000e+00 : f32
    %283 = vector.broadcast %cst_79 : f32 to vector<8x32xf32>
    %284 = arith.mulf %283, %282 : vector<8x32xf32>
    %cst_80 = arith.constant 1.000000e+00 : f32
    %285 = vector.broadcast %cst_80 : f32 to vector<8x32xf32>
    %286 = arith.subf %284, %285 : vector<8x32xf32>
    %287 = vector.extract_strided_slice %279 {offsets = [0, 96], sizes = [8, 32], strides = [1, 1]} : vector<8x128xf32> to vector<8x32xf32>
    %288 = arith.mulf %281, %268 : vector<8x32xf32>
    %289 = arith.mulf %280, %286 : vector<8x32xf32>
    %290 = arith.addf %288, %289 : vector<8x32xf32>
    %291 = math.tanh %290 : vector<8x32xf32>
    %292 = arith.mulf %287, %291 : vector<8x32xf32>
    %293 = vector.extract_strided_slice %202 {offsets = [32, 0], sizes = [8, 128], strides = [1, 1]} : vector<64x128xf32> to vector<8x128xf32>
    %294 = arith.truncf %292 : vector<8x32xf32> to vector<8x32xbf16>
    %cst_81 = arith.constant dense<0.000000e+00> : vector<8x128xf32>
    %295 = tpu.matmul %294, %196, %cst_81 {dimension_numbers = #tpu.dot_dimension_numbers<[1], [0], [0], [1], [0, 0, 1, 1], [], []>} : vector<8x32xbf16>, vector<32x128xbf16>, vector<8x128xf32> -> vector<8x128xf32>
    %296 = arith.addf %293, %295 : vector<8x128xf32>
    %297 = arith.negf %296 : vector<8x128xf32>
    %298 = math.exp %297 : vector<8x128xf32>
    %cst_82 = arith.constant 1.000000e+00 : f32
    %299 = vector.broadcast %cst_82 : f32 to vector<8x128xf32>
    %300 = arith.addf %299, %298 : vector<8x128xf32>
    %301 = arith.divf %299, %300 : vector<8x128xf32>
    %302 = vector.extract_strided_slice %301 {offsets = [0, 0], sizes = [8, 32], strides = [1, 1]} : vector<8x128xf32> to vector<8x32xf32>
    %303 = vector.extract_strided_slice %301 {offsets = [0, 32], sizes = [8, 32], strides = [1, 1]} : vector<8x128xf32> to vector<8x32xf32>
    %304 = vector.extract_strided_slice %301 {offsets = [0, 64], sizes = [8, 32], strides = [1, 1]} : vector<8x128xf32> to vector<8x32xf32>
    %cst_83 = arith.constant 2.000000e+00 : f32
    %305 = vector.broadcast %cst_83 : f32 to vector<8x32xf32>
    %306 = arith.mulf %305, %304 : vector<8x32xf32>
    %cst_84 = arith.constant 1.000000e+00 : f32
    %307 = vector.broadcast %cst_84 : f32 to vector<8x32xf32>
    %308 = arith.subf %306, %307 : vector<8x32xf32>
    %309 = vector.extract_strided_slice %301 {offsets = [0, 96], sizes = [8, 32], strides = [1, 1]} : vector<8x128xf32> to vector<8x32xf32>
    %310 = arith.mulf %303, %290 : vector<8x32xf32>
    %311 = arith.mulf %302, %308 : vector<8x32xf32>
    %312 = arith.addf %310, %311 : vector<8x32xf32>
    %313 = math.tanh %312 : vector<8x32xf32>
    %314 = arith.mulf %309, %313 : vector<8x32xf32>
    %315 = vector.extract_strided_slice %202 {offsets = [40, 0], sizes = [8, 128], strides = [1, 1]} : vector<64x128xf32> to vector<8x128xf32>
    %316 = arith.truncf %314 : vector<8x32xf32> to vector<8x32xbf16>
    %cst_85 = arith.constant dense<0.000000e+00> : vector<8x128xf32>
    %317 = tpu.matmul %316, %196, %cst_85 {dimension_numbers = #tpu.dot_dimension_numbers<[1], [0], [0], [1], [0, 0, 1, 1], [], []>} : vector<8x32xbf16>, vector<32x128xbf16>, vector<8x128xf32> -> vector<8x128xf32>
    %318 = arith.addf %315, %317 : vector<8x128xf32>
    %319 = arith.negf %318 : vector<8x128xf32>
    %320 = math.exp %319 : vector<8x128xf32>
    %cst_86 = arith.constant 1.000000e+00 : f32
    %321 = vector.broadcast %cst_86 : f32 to vector<8x128xf32>
    %322 = arith.addf %321, %320 : vector<8x128xf32>
    %323 = arith.divf %321, %322 : vector<8x128xf32>
    %324 = vector.extract_strided_slice %323 {offsets = [0, 0], sizes = [8, 32], strides = [1, 1]} : vector<8x128xf32> to vector<8x32xf32>
    %325 = vector.extract_strided_slice %323 {offsets = [0, 32], sizes = [8, 32], strides = [1, 1]} : vector<8x128xf32> to vector<8x32xf32>
    %326 = vector.extract_strided_slice %323 {offsets = [0, 64], sizes = [8, 32], strides = [1, 1]} : vector<8x128xf32> to vector<8x32xf32>
    %cst_87 = arith.constant 2.000000e+00 : f32
    %327 = vector.broadcast %cst_87 : f32 to vector<8x32xf32>
    %328 = arith.mulf %327, %326 : vector<8x32xf32>
    %cst_88 = arith.constant 1.000000e+00 : f32
    %329 = vector.broadcast %cst_88 : f32 to vector<8x32xf32>
    %330 = arith.subf %328, %329 : vector<8x32xf32>
    %331 = vector.extract_strided_slice %323 {offsets = [0, 96], sizes = [8, 32], strides = [1, 1]} : vector<8x128xf32> to vector<8x32xf32>
    %332 = arith.mulf %325, %312 : vector<8x32xf32>
    %333 = arith.mulf %324, %330 : vector<8x32xf32>
    %334 = arith.addf %332, %333 : vector<8x32xf32>
    %335 = math.tanh %334 : vector<8x32xf32>
    %336 = arith.mulf %331, %335 : vector<8x32xf32>
    %337 = vector.extract_strided_slice %202 {offsets = [48, 0], sizes = [8, 128], strides = [1, 1]} : vector<64x128xf32> to vector<8x128xf32>
    %338 = arith.truncf %336 : vector<8x32xf32> to vector<8x32xbf16>
    %cst_89 = arith.constant dense<0.000000e+00> : vector<8x128xf32>
    %339 = tpu.matmul %338, %196, %cst_89 {dimension_numbers = #tpu.dot_dimension_numbers<[1], [0], [0], [1], [0, 0, 1, 1], [], []>} : vector<8x32xbf16>, vector<32x128xbf16>, vector<8x128xf32> -> vector<8x128xf32>
    %340 = arith.addf %337, %339 : vector<8x128xf32>
    %341 = arith.negf %340 : vector<8x128xf32>
    %342 = math.exp %341 : vector<8x128xf32>
    %cst_90 = arith.constant 1.000000e+00 : f32
    %343 = vector.broadcast %cst_90 : f32 to vector<8x128xf32>
    %344 = arith.addf %343, %342 : vector<8x128xf32>
    %345 = arith.divf %343, %344 : vector<8x128xf32>
    %346 = vector.extract_strided_slice %345 {offsets = [0, 0], sizes = [8, 32], strides = [1, 1]} : vector<8x128xf32> to vector<8x32xf32>
    %347 = vector.extract_strided_slice %345 {offsets = [0, 32], sizes = [8, 32], strides = [1, 1]} : vector<8x128xf32> to vector<8x32xf32>
    %348 = vector.extract_strided_slice %345 {offsets = [0, 64], sizes = [8, 32], strides = [1, 1]} : vector<8x128xf32> to vector<8x32xf32>
    %cst_91 = arith.constant 2.000000e+00 : f32
    %349 = vector.broadcast %cst_91 : f32 to vector<8x32xf32>
    %350 = arith.mulf %349, %348 : vector<8x32xf32>
    %cst_92 = arith.constant 1.000000e+00 : f32
    %351 = vector.broadcast %cst_92 : f32 to vector<8x32xf32>
    %352 = arith.subf %350, %351 : vector<8x32xf32>
    %353 = vector.extract_strided_slice %345 {offsets = [0, 96], sizes = [8, 32], strides = [1, 1]} : vector<8x128xf32> to vector<8x32xf32>
    %354 = arith.mulf %347, %334 : vector<8x32xf32>
    %355 = arith.mulf %346, %352 : vector<8x32xf32>
    %356 = arith.addf %354, %355 : vector<8x32xf32>
    %357 = math.tanh %356 : vector<8x32xf32>
    %358 = arith.mulf %353, %357 : vector<8x32xf32>
    %359 = vector.extract_strided_slice %202 {offsets = [56, 0], sizes = [8, 128], strides = [1, 1]} : vector<64x128xf32> to vector<8x128xf32>
    %360 = arith.truncf %358 : vector<8x32xf32> to vector<8x32xbf16>
    %cst_93 = arith.constant dense<0.000000e+00> : vector<8x128xf32>
    %361 = tpu.matmul %360, %196, %cst_93 {dimension_numbers = #tpu.dot_dimension_numbers<[1], [0], [0], [1], [0, 0, 1, 1], [], []>} : vector<8x32xbf16>, vector<32x128xbf16>, vector<8x128xf32> -> vector<8x128xf32>
    %362 = arith.addf %359, %361 : vector<8x128xf32>
    %363 = arith.negf %362 : vector<8x128xf32>
    %364 = math.exp %363 : vector<8x128xf32>
    %cst_94 = arith.constant 1.000000e+00 : f32
    %365 = vector.broadcast %cst_94 : f32 to vector<8x128xf32>
    %366 = arith.addf %365, %364 : vector<8x128xf32>
    %367 = arith.divf %365, %366 : vector<8x128xf32>
    %368 = vector.extract_strided_slice %367 {offsets = [0, 0], sizes = [8, 32], strides = [1, 1]} : vector<8x128xf32> to vector<8x32xf32>
    %369 = vector.extract_strided_slice %367 {offsets = [0, 32], sizes = [8, 32], strides = [1, 1]} : vector<8x128xf32> to vector<8x32xf32>
    %370 = vector.extract_strided_slice %367 {offsets = [0, 64], sizes = [8, 32], strides = [1, 1]} : vector<8x128xf32> to vector<8x32xf32>
    %cst_95 = arith.constant 2.000000e+00 : f32
    %371 = vector.broadcast %cst_95 : f32 to vector<8x32xf32>
    %372 = arith.mulf %371, %370 : vector<8x32xf32>
    %cst_96 = arith.constant 1.000000e+00 : f32
    %373 = vector.broadcast %cst_96 : f32 to vector<8x32xf32>
    %374 = arith.subf %372, %373 : vector<8x32xf32>
    %375 = vector.extract_strided_slice %367 {offsets = [0, 96], sizes = [8, 32], strides = [1, 1]} : vector<8x128xf32> to vector<8x32xf32>
    %376 = arith.mulf %369, %356 : vector<8x32xf32>
    %377 = arith.mulf %368, %374 : vector<8x32xf32>
    %378 = arith.addf %376, %377 : vector<8x32xf32>
    %379 = math.tanh %378 : vector<8x32xf32>
    %380 = arith.mulf %375, %379 : vector<8x32xf32>
    %381 = arith.truncf %380 : vector<8x32xf32> to vector<8x32xbf16>
    %cst_97 = arith.constant dense<0.000000e+00> : vector<8x128xf32>
    %382 = tpu.matmul %381, %0, %cst_97 {dimension_numbers = #tpu.dot_dimension_numbers<[1], [0], [0], [1], [0, 0, 1, 1], [], []>} : vector<8x32xbf16>, vector<32x128xbf16>, vector<8x128xf32> -> vector<8x128xf32>
    %383 = vector.broadcast %1 : vector<1x128xf32> to vector<8x128xf32>
    %384 = arith.addf %382, %383 : vector<8x128xf32>
    %c0_98 = arith.constant 0 : index
    %c0_99 = arith.constant 0 : index
    %385 = vector.load %arg9[%c0_98, %c0_99] : memref<8x128xf32, #tpu.memory_space<vmem>>, vector<8x128xf32>
    tpu.vector_store %arg9[%c0_98, %c0_99], %384 {strides = array<i32>} : memref<8x128xf32, #tpu.memory_space<vmem>>, vector<8x128xf32>,
    return
  }
}

</mosaic_0001>

<bundles_post_ra>
// kernel: tpu_custom_call.1
= control target key start
LH: loop header
LB: loop body
LE: loop exit
PB: predicated region body
PF: predicated region fallthrough
CT: control target
= control target key end

     0   :  { %14 = vsyncpa [#allocation4], 0  ;;  %s2492_s0 = inlined_call_operand.vmem [shape: bf16[64,16], index: 0, kind: input, shape index: {}]   ;;  %s2493_s1 = inlined_call_operand.hbm [shape: bf16[16,128], index: 1, kind: input, shape index: {}]   ;;  %s2494_s2 = inlined_call_operand.vmem [shape: bf16[32,128], index: 2, kind: input, shape index: {}]   ;;  %s2495_s3 = inlined_call_operand.vmem [shape: f32[1,128], index: 3, kind: input, shape index: {}]   ;;  %s2496_s4 = inlined_call_operand.vmem [shape: bf16[32,128], index: 4, kind: input, shape index: {}]   ;;  %s2497_s5 = inlined_call_operand.vmem [shape: bf16[32,128], index: 5, kind: input, shape index: {}]   ;;  %s2498_s6 = inlined_call_operand.vmem [shape: f32[1,128], index: 6, kind: input, shape index: {}]   ;;  %s2499_s7 = inlined_call_operand.vmem [shape: bf16[32,128], index: 7, kind: input, shape index: {}]   ;;  %s2500_s8 = inlined_call_operand.vmem [shape: f32[1,128], index: 8, kind: input, shape index: {}]   ;;  %s2501_s9 = inlined_call_operand.hbm [shape: f32[8,128], index: 9, kind: output, shape index: {}]  }
   0x1   :  { %15 = vsyncpa [#allocation5], 0  ;;  %s2053_s30 = smov [#allocation3]   ;;  %s2005_s13 = scalar_lea.hbm %s2493_s1, 128 }
   0x2   :  { %s23_s10 = sshll.u32 %s2053_s30, 4  ;;  %p2006_p0 = scmp.ne.s32.totalorder %s2493_s1, %s2005_s13  ;;  %s24_s10 = int_to_ptr.vmem [resolvable:$true] %s23_s10 }
   0x3   :  { %p2009_p1 = scmp.lt.u32.totalorder %s2005_s13, %s2493_s1 }
   0x5   :  { %p2011_p2 = pnand %p2009_p1, %p2006_p0 }
   0x7   :  { %2014 = shalt.err (!%p2011_p2)
}
   0x8   :  { %s2015_s18 = scalar_lea.vmem %s24_s10, 128  ;;  %p2020_p4 = scmp.lt.s32.totalorder %s24_s10, %s24_s10 }
   0x9   :  { %p2016_p3 = scmp.ne.s32.totalorder %s24_s10, %s2015_s18  ;;  %p2021_p5 = scmp.lt.s32.totalorder %s2015_s18, %s2015_s18 }
   0xb   :  { %p2022_p6 = por %p2021_p5, %p2020_p4 }
   0xd   :  { %p2023_p7 = pnand %p2022_p6, %p2016_p3 }
   0xf   :  { %2026 = shalt.err (!%p2023_p7)
}
  0x10   :  { %s2054_s19 = smov 64   ;;  %s2055_s20 = smov 4  }
  0x11   :  { %29 = dma.hbm_to_vmem [thread:$0]  %s2493_s1, 128, %s24_s10, [#allocation4], %s2054_s19, %s2054_s19, %s2055_s20  }
  0x12   :  { %2049 = dma.done.wait [#allocation4], 128  }
  0x13   :  { %2050 = vsyncadd [#allocation4], 4294967168  ;;  %v2056_v0 = vmov 0.0   ;;  %vm2057_vm0 = vmmov 0   ;;  %v1896_v1 = vld [vmem:[#allocation3] sm:$0xff]   ;;  %vm100_vm1 = vcmask 130048  }
  0x14   :  { %1740 = vmatprep.subr.bf16.mxu1 %v2056_v0  ;;  %1744 = vmatprep.mubr.msk.bf16.mxu1 %vm2057_vm0, %v2056_v0  ;;  %v2131_v2 = vld [vmem:[%s2494_s2] sm:$0xff]   ;;  %v1899_v4 = vld [vmem:[%s2492_s0 + $0x8] sm:$0xff]   ;;  %v2058_v6 = vmov 0   ;;  %vm190_vm2 = vcmask 261120   ;;  %v1901_v51 = vld [vmem:[%s2492_s0 + $0x10] sm:$0xff]   ;;  %s2060_s1 = smov [#allocation6]  }
  0x15   :  { %1730 = vmatprep.subr.bf16.mxu0 %v1896_v1  ;;  %v1898_v3 = vld [vmem:[%s2492_s0] sm:$0xff]   ;;  %1741 = vmatpush3.bf16.msra.mxu1 %v2131_v2  ;;  %v2145_v5 = vld [vmem:[%s2494_s2 + $0x8] sm:$0xff]   ;;  %v1902_v52 = vld [vmem:[%s2492_s0 + $0x18] sm:$0xff]  }
  0x16   :  { %1731 = vmatpush3.bf16.msra.mxu0 %v1896_v1  ;;  %1732 = vmatprep.mubr.msk.bf16.mxu0 %vm100_vm1, %v1898_v3  ;;  %v2165_v7 = vld [vmem:[%s2495_s3] ss:$0 sm:$0xff]  ;;  %s2059_s3 = smov 32  }
  0x17   :  { %1742 = vmatprep.subr.bf16.mxu1 %v2056_v0  ;;  %1756 = vmatprep.subr.bf16.mxu0 %v2056_v0 }
  0x19   :  { %1733 = vmatmul.mubr.msk.bf16.vlgmr.msra.gmra.mrb[0].mxu0 %vm100_vm1, %v1899_v4  ;;  %1743 = vmatpush3.bf16.msra.mxu1 %v2145_v5 }
  0x1a   :  { %1757 = vmatpush3.bf16.msra.mxu0 %v2131_v2  ;;  %1748 = vmatprep.subr.bf16.mxu1 %v2056_v0 }
  0x1b   :  { %1758 = vmatprep.subr.bf16.mxu0 %v2056_v0  ;;  %1736 = vmatprep.mubr.msk.bf16.mxu0 %vm100_vm1, %v1901_v51 }
  0x1c   :  { %1745 = vmatmul.mubr.bf16.vlgmr.msra.gmra.mrb[0].mxu1 %v2058_v6 }
  0x1d   :  { %1749 = vmatpush3.bf16.msra.mxu1 %v2131_v2  ;;  %1752 = vmatprep.mubr.msk.bf16.mxu1 %vm2057_vm0, %v2056_v0 }
  0x1e   :  { %1750 = vmatprep.subr.bf16.mxu1 %v2056_v0  ;;  %1759 = vmatpush3.bf16.msra.mxu0 %v2145_v5 }
  0x1f   :  { %1772 = vmatprep.subr.bf16.mxu0 %v2056_v0 }
  0x21   :  { %1751 = vmatpush3.bf16.msra.mxu1 %v2145_v5  ;;  %1737 = vmatmul.mubr.msk.bf16.gmra.mrb[4].mxu0 %vm100_vm1, %v1902_v52 }
  0x22   :  { %1764 = vmatprep.subr.bf16.mxu1 %v2056_v0  ;;  %1760 = vmatprep.mubr.msk.bf16.mxu0 %vm2057_vm0, %v2056_v0 }
  0xec   :  { %v2167_v8 = vpop.f32.mrb[0].mxu0 }
  0xed   :  { %v147_v9 = vpop.f32.mrb[1].mxu0  ;;  %v156_v62 = vadd.f32 %v2167_v8, %v2165_v7 }
  0xee   :  { %v148_v10 = vadd.f32 %v2165_v7, %v147_v9  ;;  %v2170_v11 = vpop.f32.mrb[2].mxu0 }
  0xef   :  { %v150_v12 = vpop.f32.mrb[3].mxu0  ;;  %v228_v13 = vpop.f32.mrb[0].mxu1 }
  0xf0   :  { %v234_v14 = vadd.f32 %v228_v13, %v148_v10  ;;  %v1746_v15 = vpop.f32.mrb[1].mxu1  ;;  %v151_v34 = vadd.f32 %v2165_v7, %v150_v12 }
  0xf1   :  { %v231_v16 = vpop.f32.mrb[2].mxu1 }
  0xf2   :  { %v1609_v17 = vmul.f32 -1.442695, %v234_v14  ;;  %v1747_v18 = vpop.f32.mrb[3].mxu1 }
  0xf4   :  { %1909 = vpow2.f32 %v1609_v17  ;;  %v2206_v57 = vpop.f32.mrb[4].mxu0 }
  0xf5   :  { %v2208_v58 = vpop.f32.mrb[5].mxu0 }
  0xf6   :  { %v2210_v59 = vpop.f32.mrb[6].mxu0 }
  0xf7   :  { %v2212_v60 = vpop.f32.mrb[7].mxu0 }
  0xfe   :  { %v1910_v19 = vpop.eup %1909 }
  0xff   :  { %v238_v20 = vadd.f32 1.0, %v1910_v19 }
 0x101   :  { %1911 = vrcp.f32 %v238_v20 }
 0x10b   :  { %v1912_v21 = vpop.eup %1911 }
 0x10c   :  { %v241_v22 = vmul.f32 2.0, %v1912_v21  ;;  %v243_v26 = vmul.f32 0.0, %v1912_v21 }
 0x10e   :  { %v1610_v23 = vadd.f32 -1.0, %v241_v22 }
 0x110   :  { %245 = vrot.lane.b32.xlu0 %v1610_v23, %s2054_s19 }
 0x182   :  { %v246_v24 = vpop.permute.xlu0 %245 }
 0x183   :  { %v248_v25 = vmul.f32 %v1912_v21, %v246_v24 }
 0x185   :  { %250 = vrot.lane.b32.xlu0 %v248_v25, %s2059_s3 }
 0x1f7   :  { %v251_v27 = vpop.permute.xlu0 %250 }
 0x1f8   :  { %v253_v28 = vadd.f32 %v251_v27, %v243_v26  ;;  %v159_v26 = vadd.f32 %v2170_v11, %v2165_v7 }
 0x1fa   :  { %1913 = vtanh.f32 %v253_v28 }
 0x204   :  { %v1914_v29 = vpop.eup %1913 }
 0x205   :  { %256 = vrot.lane.b32.xlu1 %v1914_v29, %s2054_s19 }
 0x277   :  { %v257_v30 = vpop.permute.xlu1 %256 }
 0x278   :  { %v2175_v31 = vmul.f32 %v1912_v21, %v257_v30 }
 0x27a   :  { %v265_v32 = vpack.c.bf16 %v2175_v31, %v2175_v31 }
 0x27c   :  { %267 = vrot.lane.b32.xlu1 %v265_v32, %s2059_s3 }
 0x2ee   :  { %v268_v33 = vpop.permute.xlu1 %267 }
 0x2ef   :  { %1753 = vmatmul.mubr.msk.bf16.vlgmr.msra.gmra.mrb[4].mxu1 %vm190_vm2, %v268_v33 }
 0x2f0   :  { %1765 = vmatpush3.bf16.msra.mxu1 %v2131_v2  ;;  %1768 = vmatprep.mubr.msk.bf16.mxu1 %vm2057_vm0, %v2056_v0 }
 0x2f1   :  { %1766 = vmatprep.subr.bf16.mxu1 %v2056_v0 }
 0x2f4   :  { %1767 = vmatpush3.bf16.msra.mxu1 %v2145_v5 }
 0x2f5   :  { %1780 = vmatprep.subr.bf16.mxu1 %v2056_v0 }
 0x3c2   :  { %v306_v35 = vpop.f32.mrb[4].mxu1 }
 0x3c3   :  { %v312_v36 = vadd.f32 %v306_v35, %v151_v34  ;;  %v1754_v37 = vpop.f32.mrb[5].mxu1 }
 0x3c4   :  { %v309_v38 = vpop.f32.mrb[6].mxu1 }
 0x3c5   :  { %v1612_v39 = vmul.f32 -1.442695, %v312_v36  ;;  %v1755_v40 = vpop.f32.mrb[7].mxu1 }
 0x3c7   :  { %1915 = vpow2.f32 %v1612_v39 }
 0x3d1   :  { %v1916_v41 = vpop.eup %1915 }
 0x3d2   :  { %v316_v42 = vadd.f32 1.0, %v1916_v41 }
 0x3d4   :  { %1917 = vrcp.f32 %v316_v42 }
 0x3de   :  { %v1918_v43 = vpop.eup %1917 }
 0x3df   :  { %v319_v44 = vmul.f32 2.0, %v1918_v43  ;;  %v321_v48 = vmul.f32 %v1918_v43, %v253_v28 }
 0x3e1   :  { %v1613_v45 = vadd.f32 -1.0, %v319_v44 }
 0x3e3   :  { %323 = vrot.lane.b32.xlu0 %v1613_v45, %s2054_s19 }
 0x455   :  { %v324_v46 = vpop.permute.xlu0 %323 }
 0x456   :  { %v326_v47 = vmul.f32 %v1918_v43, %v324_v46 }
 0x458   :  { %328 = vrot.lane.b32.xlu1 %v326_v47, %s2059_s3 }
 0x4ca   :  { %v329_v49 = vpop.permute.xlu1 %328 }
 0x4cb   :  { %v331_v50 = vadd.f32 %v329_v49, %v321_v48  ;;  %v164_v48 = vadd.f32 %v2165_v7, %v2208_v58 }
 0x4cd   :  { %1919 = vtanh.f32 %v331_v50 }
 0x4d7   :  { %v1920_v53 = vpop.eup %1919 }
 0x4d8   :  { %334 = vrot.lane.b32.xlu0 %v1920_v53, %s2054_s19 }
 0x54a   :  { %v335_v54 = vpop.permute.xlu0 %334 }
 0x54b   :  { %v2201_v55 = vmul.f32 %v1918_v43, %v335_v54 }
 0x54d   :  { %v343_v56 = vpack.c.bf16 %v2201_v55, %v2201_v55 }
 0x54f   :  { %345 = vrot.lane.b32.xlu1 %v343_v56, %s2059_s3 }
 0x5c1   :  { %v346_v61 = vpop.permute.xlu1 %345 }
 0x5c2   :  { %1761 = vmatmul.mubr.msk.bf16.vlgmr.msra.gmra.mrb[8].mxu0 %vm190_vm2, %v346_v61 }
 0x5c3   :  { %1773 = vmatpush3.bf16.msra.mxu0 %v2131_v2  ;;  %1776 = vmatprep.mubr.msk.bf16.mxu0 %vm2057_vm0, %v2056_v0 }
 0x5c4   :  { %1774 = vmatprep.subr.bf16.mxu0 %v2056_v0 }
 0x5c7   :  { %1775 = vmatpush3.bf16.msra.mxu0 %v2145_v5 }
 0x5c8   :  { %1788 = vmatprep.subr.bf16.mxu0 %v2056_v0 }
 0x695   :  { %v384_v63 = vpop.f32.mrb[8].mxu0 }
 0x696   :  { %v390_v1 = vadd.f32 %v384_v63, %v156_v62  ;;  %v1762_v3 = vpop.f32.mrb[9].mxu0 }
 0x697   :  { %v387_v4 = vpop.f32.mrb[10].mxu0 }
 0x698   :  { %v1615_v9 = vmul.f32 -1.442695, %v390_v1  ;;  %v1763_v10 = vpop.f32.mrb[11].mxu0 }
 0x69a   :  { %1921 = vpow2.f32 %v1615_v9 }
 0x6a4   :  { %v1922_v12 = vpop.eup %1921 }
 0x6a5   :  { %v394_v13 = vadd.f32 1.0, %v1922_v12 }
 0x6a7   :  { %1923 = vrcp.f32 %v394_v13 }
 0x6b1   :  { %v1924_v14 = vpop.eup %1923 }
 0x6b2   :  { %v397_v15 = vmul.f32 2.0, %v1924_v14  ;;  %v399_v8 = vmul.f32 %v1924_v14, %v331_v50 }
 0x6b4   :  { %v1616_v16 = vadd.f32 -1.0, %v397_v15 }
 0x6b6   :  { %401 = vrot.lane.b32.xlu0 %v1616_v16, %s2054_s19 }
 0x728   :  { %v402_v17 = vpop.permute.xlu0 %401 }
 0x729   :  { %v404_v18 = vmul.f32 %v1924_v14, %v402_v17  ;;  %v167_v17 = vadd.f32 %v2165_v7, %v2212_v60 }
 0x72b   :  { %406 = vrot.lane.b32.xlu1 %v404_v18, %s2059_s3 }
 0x79d   :  { %v407_v19 = vpop.permute.xlu1 %406 }
 0x79e   :  { %v409_v20 = vadd.f32 %v407_v19, %v399_v8 }
 0x7a0   :  { %1925 = vtanh.f32 %v409_v20 }
 0x7aa   :  { %v1926_v21 = vpop.eup %1925 }
 0x7ab   :  { %412 = vrot.lane.b32.xlu0 %v1926_v21, %s2054_s19 }
 0x81d   :  { %v413_v22 = vpop.permute.xlu0 %412 }
 0x81e   :  { %v2226_v23 = vmul.f32 %v1924_v14, %v413_v22 }
 0x820   :  { %v421_v24 = vpack.c.bf16 %v2226_v23, %v2226_v23 }
 0x822   :  { %423 = vrot.lane.b32.xlu1 %v421_v24, %s2059_s3 }
 0x894   :  { %v424_v25 = vpop.permute.xlu1 %423 }
 0x895   :  { %1769 = vmatmul.mubr.msk.bf16.vlgmr.msra.gmra.mrb[8].mxu1 %vm190_vm2, %v424_v25 }
 0x896   :  { %1781 = vmatpush3.bf16.msra.mxu1 %v2131_v2  ;;  %1784 = vmatprep.mubr.msk.bf16.mxu1 %vm2057_vm0, %v2056_v0 }
 0x897   :  { %1782 = vmatprep.subr.bf16.mxu1 %v2056_v0 }
 0x89a   :  { %1783 = vmatpush3.bf16.msra.mxu1 %v2145_v5 }
 0x89b   :  { %1796 = vmatprep.subr.bf16.mxu1 %v2056_v0 }
 0x968   :  { %v462_v27 = vpop.f32.mrb[8].mxu1 }
 0x969   :  { %v468_v28 = vadd.f32 %v462_v27, %v159_v26  ;;  %v1770_v29 = vpop.f32.mrb[9].mxu1 }
 0x96a   :  { %v465_v30 = vpop.f32.mrb[10].mxu1 }
 0x96b   :  { %v1618_v32 = vmul.f32 -1.442695, %v468_v28  ;;  %v1771_v33 = vpop.f32.mrb[11].mxu1 }
 0x96d   :  { %1927 = vpow2.f32 %v1618_v32 }
 0x977   :  { %v1928_v34 = vpop.eup %1927 }
 0x978   :  { %v472_v35 = vadd.f32 1.0, %v1928_v34 }
 0x97a   :  { %1929 = vrcp.f32 %v472_v35 }
 0x984   :  { %v1930_v36 = vpop.eup %1929 }
 0x985   :  { %v475_v37 = vmul.f32 2.0, %v1930_v36  ;;  %v477_v11 = vmul.f32 %v1930_v36, %v409_v20 }
 0x987   :  { %v1619_v38 = vadd.f32 -1.0, %v475_v37  ;;  %v172_v37 = vadd.f32 %v2206_v57, %v2165_v7 }
 0x989   :  { %479 = vrot.lane.b32.xlu0 %v1619_v38, %s2054_s19 }
 0x9fb   :  { %v480_v39 = vpop.permute.xlu0 %479 }
 0x9fc   :  { %v482_v40 = vmul.f32 %v1930_v36, %v480_v39 }
 0x9fe   :  { %484 = vrot.lane.b32.xlu1 %v482_v40, %s2059_s3 }
 0xa70   :  { %v485_v41 = vpop.permute.xlu1 %484 }
 0xa71   :  { %v487_v42 = vadd.f32 %v485_v41, %v477_v11 }
 0xa73   :  { %1931 = vtanh.f32 %v487_v42 }
 0xa7d   :  { %v1932_v43 = vpop.eup %1931 }
 0xa7e   :  { %490 = vrot.lane.b32.xlu0 %v1932_v43, %s2054_s19 }
 0xaf0   :  { %v491_v44 = vpop.permute.xlu0 %490 }
 0xaf1   :  { %v2243_v45 = vmul.f32 %v1930_v36, %v491_v44 }
 0xaf3   :  { %v499_v46 = vpack.c.bf16 %v2243_v45, %v2243_v45 }
 0xaf5   :  { %501 = vrot.lane.b32.xlu1 %v499_v46, %s2059_s3 }
 0xb67   :  { %v502_v47 = vpop.permute.xlu1 %501 }
 0xb68   :  { %1777 = vmatmul.mubr.msk.bf16.vlgmr.msra.gmra.mrb[12].mxu0 %vm190_vm2, %v502_v47 }
 0xb69   :  { %1789 = vmatpush3.bf16.msra.mxu0 %v2131_v2  ;;  %1792 = vmatprep.mubr.msk.bf16.mxu0 %vm2057_vm0, %v2056_v0 }
 0xb6a   :  { %1790 = vmatprep.subr.bf16.mxu0 %v2056_v0 }
 0xb6d   :  { %1791 = vmatpush3.bf16.msra.mxu0 %v2145_v5 }
 0xc3b   :  { %v540_v49 = vpop.f32.mrb[12].mxu0 }
 0xc3c   :  { %v546_v50 = vadd.f32 %v540_v49, %v164_v48  ;;  %v1778_v51 = vpop.f32.mrb[13].mxu0 }
 0xc3d   :  { %v543_v52 = vpop.f32.mrb[14].mxu0 }
 0xc3e   :  { %v1621_v53 = vmul.f32 -1.442695, %v546_v50  ;;  %v1779_v54 = vpop.f32.mrb[15].mxu0 }
 0xc40   :  { %1933 = vpow2.f32 %v1621_v53 }
 0xc4a   :  { %v1934_v56 = vpop.eup %1933 }
 0xc4b   :  { %v550_v61 = vadd.f32 1.0, %v1934_v56  ;;  %v1903_v56 = vld [vmem:[%s2496_s4] sm:$0xff]  }
 0xc4c   :  { %1804 = vmatprep.subr.bf16.mxu0 %v1903_v56 }
 0xc4d   :  { %1935 = vrcp.f32 %v550_v61 }
 0xc57   :  { %v1936_v62 = vpop.eup %1935 }
 0xc58   :  { %v553_v63 = vmul.f32 2.0, %v1936_v62  ;;  %v555_v58 = vmul.f32 %v1936_v62, %v487_v42 }
 0xc5a   :  { %v1622_v1 = vadd.f32 -1.0, %v553_v63 }
 0xc5c   :  { %557 = vrot.lane.b32.xlu0 %v1622_v1, %s2054_s19 }
 0xcce   :  { %v558_v3 = vpop.permute.xlu0 %557 }
 0xccf   :  { %v560_v4 = vmul.f32 %v1936_v62, %v558_v3 }
 0xcd1   :  { %562 = vrot.lane.b32.xlu1 %v560_v4, %s2059_s3 }
 0xd43   :  { %v563_v9 = vpop.permute.xlu1 %562 }
 0xd44   :  { %v565_v10 = vadd.f32 %v563_v9, %v555_v58 }
 0xd46   :  { %1937 = vtanh.f32 %v565_v10 }
 0xd50   :  { %v1938_v12 = vpop.eup %1937 }
 0xd51   :  { %568 = vrot.lane.b32.xlu0 %v1938_v12, %s2054_s19  ;;  %v2318_v12 = vld [vmem:[%s2497_s5] sm:$0xff]  }
 0xdc3   :  { %v569_v13 = vpop.permute.xlu0 %568 }
 0xdc4   :  { %v2259_v14 = vmul.f32 %v1936_v62, %v569_v13  ;;  %v2326_v13 = vld [vmem:[%s2497_s5 + $0x8] sm:$0xff]  }
 0xdc6   :  { %v577_v15 = vpack.c.bf16 %v2259_v14, %v2259_v14 }
 0xdc8   :  { %579 = vrot.lane.b32.xlu1 %v577_v15, %s2059_s3 }
 0xe3a   :  { %v580_v16 = vpop.permute.xlu1 %579 }
 0xe3b   :  { %1785 = vmatmul.mubr.msk.bf16.vlgmr.msra.gmra.mrb[12].mxu1 %vm190_vm2, %v580_v16 }
 0xe3c   :  { %1797 = vmatpush3.bf16.msra.mxu1 %v2131_v2  ;;  %1800 = vmatprep.mubr.msk.bf16.mxu1 %vm2057_vm0, %v2056_v0 }
 0xe3d   :  { %1798 = vmatprep.subr.bf16.mxu1 %v2056_v0 }
 0xe40   :  { %1799 = vmatpush3.bf16.msra.mxu1 %v2145_v5 }
 0xe41   :  { %1816 = vmatprep.subr.bf16.mxu1 %v2056_v0 }
 0xf0e   :  { %v618_v18 = vpop.f32.mrb[12].mxu1 }
 0xf0f   :  { %v624_v8 = vadd.f32 %v618_v18, %v167_v17  ;;  %v1786_v19 = vpop.f32.mrb[13].mxu1 }
 0xf10   :  { %v621_v20 = vpop.f32.mrb[14].mxu1 }
 0xf11   :  { %v1624_v21 = vmul.f32 -1.442695, %v624_v8  ;;  %v1787_v22 = vpop.f32.mrb[15].mxu1 }
 0xf13   :  { %1939 = vpow2.f32 %v1624_v21 }
 0xf1d   :  { %v1940_v2 = vpop.eup %1939 }
 0xf1e   :  { %v628_v24 = vadd.f32 1.0, %v1940_v2 }
 0xf20   :  { %1941 = vrcp.f32 %v628_v24  ;;  %v2355_v24 = vld [vmem:[%s2498_s6] ss:$0 sm:$0xff] }
 0xf2a   :  { %v1942_v25 = vpop.eup %1941 }
 0xf2b   :  { %v631_v26 = vmul.f32 2.0, %v1942_v25  ;;  %v633_v60 = vmul.f32 %v1942_v25, %v565_v10 }
 0xf2d   :  { %v1625_v27 = vadd.f32 -1.0, %v631_v26 }
 0xf2f   :  { %635 = vrot.lane.b32.xlu0 %v1625_v27, %s2054_s19 }
 0xfa1   :  { %v636_v5 = vpop.permute.xlu0 %635 }
 0xfa2   :  { %v638_v28 = vmul.f32 %v1942_v25, %v636_v5 }
 0xfa4   :  { %640 = vrot.lane.b32.xlu1 %v638_v28, %s2059_s3 }
0x1016   :  { %v641_v29 = vpop.permute.xlu1 %640 }
0x1017   :  { %v643_v30 = vadd.f32 %v641_v29, %v633_v60 }
0x1019   :  { %1943 = vtanh.f32 %v643_v30 }
0x1023   :  { %v1944_v32 = vpop.eup %1943 }
0x1024   :  { %646 = vrot.lane.b32.xlu0 %v1944_v32, %s2054_s19 }
0x1096   :  { %v647_v33 = vpop.permute.xlu0 %646 }
0x1097   :  { %v2276_v34 = vmul.f32 %v1942_v25, %v647_v33 }
0x1099   :  { %v655_v35 = vpack.c.bf16 %v2276_v34, %v2276_v34 }
0x109b   :  { %657 = vrot.lane.b32.xlu1 %v655_v35, %s2059_s3 }
0x110d   :  { %v658_v36 = vpop.permute.xlu1 %657 }
0x110e   :  { %1793 = vmatmul.mubr.msk.bf16.vlgmr.msra.gmra.mrb[16].mxu0 %vm190_vm2, %v658_v36 }
0x110f   :  { %1805 = vmatpush3.bf16.msra.mxu0 %v1903_v56 }
0x11e1   :  { %v696_v38 = vpop.f32.mrb[16].mxu0 }
0x11e2   :  { %v702_v39 = vadd.f32 %v696_v38, %v172_v37  ;;  %v1794_v40 = vpop.f32.mrb[17].mxu0 }
0x11e3   :  { %v699_v11 = vpop.f32.mrb[18].mxu0 }
0x11e4   :  { %v1627_v41 = vmul.f32 -1.442695, %v702_v39  ;;  %v1795_v42 = vpop.f32.mrb[19].mxu0 }
0x11e6   :  { %1945 = vpow2.f32 %v1627_v41 }
0x11f0   :  { %v1946_v43 = vpop.eup %1945 }
0x11f1   :  { %v706_v44 = vadd.f32 1.0, %v1946_v43 }
0x11f3   :  { %1947 = vrcp.f32 %v706_v44 }
0x11fd   :  { %v1948_v46 = vpop.eup %1947 }
0x11fe   :  { %v709_v47 = vmul.f32 2.0, %v1948_v46  ;;  %v711_v57 = vmul.f32 %v1948_v46, %v643_v30 }
0x1200   :  { %v1628_v48 = vadd.f32 -1.0, %v709_v47 }
0x1202   :  { %713 = vrot.lane.b32.xlu0 %v1628_v48, %s2054_s19 }
0x1274   :  { %v714_v49 = vpop.permute.xlu0 %713 }
0x1275   :  { %v716_v50 = vmul.f32 %v1948_v46, %v714_v49 }
0x1277   :  { %718 = vrot.lane.b32.xlu1 %v716_v50, %s2059_s3 }
0x127b   :  { %261 = vrot.lane.b32.xlu1 %v2175_v31, %s2059_s3  ;;  %v1904_v31 = vld [vmem:[%s2496_s4 + $0x8] sm:$0xff]  }
0x127c   :  { %1806 = vmatprep.subr.bf16.mxu0 %v1904_v31 }
0x127d   :  { %1807 = vmatpush3.bf16.msra.mxu0 %v1904_v31 }
0x127e   :  { %1832 = vmatprep.subr.bf16.mxu0 %v2056_v0 }
0x127f   :  { %417 = vrot.lane.b32.xlu1 %v2226_v23, %s2059_s3 }
0x12e9   :  { %v719_v51 = vpop.permute.xlu1 %718 }
0x12ea   :  { %v2290_v52 = vadd.f32 %v719_v51, %v711_v57 }
0x12ec   :  { %1949 = vtanh.f32 %v2290_v52 }
0x12ed   :  { %v262_v53 = vpop.permute.xlu1 %261 }
0x12ee   :  { %264 = vst.msk [vmem:[#allocation2] sm:$0xff] %vm190_vm2, %v262_v53 }
0x12f1   :  { %v418_v54 = vpop.permute.xlu1 %417 }
0x12f2   :  { %420 = vst.msk [vmem:[#allocation2 + $0x10] sm:$0xff] %vm190_vm2, %v418_v54 }
0x12f5   :  { %v820_v4 = vld [vmem:[#allocation2] sm:$0xff] }
0x12f6   :  { %v1950_v23 = vpop.eup %1949 }
0x12f7   :  { %724 = vrot.lane.b32.xlu0 %v1950_v23, %s2054_s19 }
0x12fb   :  { %339 = vrot.lane.b32.xlu0 %v2201_v55, %s2059_s3 }
0x12ff   :  { %495 = vrot.lane.b32.xlu0 %v2243_v45, %s2059_s3  ;;  %v822_v45 = vld [vmem:[#allocation2 + $0x10] sm:$0xff] }
0x1369   :  { %v725_v61 = vpop.permute.xlu0 %724 }
0x136a   :  { %v2307_v62 = vmul.f32 %v1948_v46, %v725_v61 }
0x136c   :  { %v733_v63 = vpack.c.bf16 %v2307_v62, %v2307_v62 }
0x136d   :  { %v340_v1 = vpop.permute.xlu0 %339 }
0x136e   :  { %342 = vst.msk [vmem:[#allocation2 + $0x8] sm:$0xff] %vm190_vm2, %v340_v1  ;;  %735 = vrot.lane.b32.xlu1 %v733_v63, %s2059_s3 }
0x1371   :  { %v496_v3 = vpop.permute.xlu0 %495 }
0x1372   :  { %498 = vst.msk [vmem:[#allocation2 + $0x18] sm:$0xff] %vm190_vm2, %v496_v3 }
0x1375   :  { %v821_v58 = vld [vmem:[#allocation2 + $0x8] sm:$0xff] }
0x1376   :  { %v828_v55 = vpack.c.bf16 %v821_v58, %v820_v4 }
0x1378   :  { %1808 = vmatprep.mubr.msk.bf16.mxu0 %vm190_vm2, %v828_v55 }
0x1379   :  { %v823_v9 = vld [vmem:[#allocation2 + $0x18] sm:$0xff] }
0x137a   :  { %v829_v10 = vpack.c.bf16 %v823_v9, %v822_v45 }
0x137c   :  { %1809 = vmatmul.mubr.msk.bf16.vlgmr.msra.gmra.mrb[20].mxu0 %vm190_vm2, %v829_v10 }
0x137d   :  { %1833 = vmatpush3.bf16.msra.mxu0 %v2318_v12 }
0x137e   :  { %1834 = vmatprep.subr.bf16.mxu0 %v2056_v0 }
0x1381   :  { %1835 = vmatpush3.bf16.msra.mxu0 %v2326_v13 }
0x1382   :  { %1848 = vmatprep.subr.bf16.mxu0 %v2056_v0 }
0x13e0   :  { %v736_v15 = vpop.permute.xlu1 %735 }
0x13e1   :  { %1801 = vmatmul.mubr.msk.bf16.vlgmr.msra.gmra.mrb[16].mxu1 %vm190_vm2, %v736_v15 }
0x13e2   :  { %1817 = vmatpush3.bf16.msra.mxu1 %v2318_v12  ;;  %1820 = vmatprep.mubr.msk.bf16.mxu1 %vm2057_vm0, %v2056_v0 }
0x13e3   :  { %1818 = vmatprep.subr.bf16.mxu1 %v2056_v0 }
0x13e6   :  { %1819 = vmatpush3.bf16.msra.mxu1 %v2326_v13 }
0x13e7   :  { %1824 = vmatprep.subr.bf16.mxu1 %v2056_v0 }
0x13e9   :  { %1821 = vmatmul.mubr.bf16.vlgmr.msra.gmra.mrb[20].mxu1 %v2058_v6  ;;  %v175_v6 = vadd.f32 %v2210_v59, %v2165_v7 }
0x13ea   :  { %1825 = vmatpush3.bf16.msra.mxu1 %v2318_v12  ;;  %1828 = vmatprep.mubr.msk.bf16.mxu1 %vm2057_vm0, %v2056_v0 }
0x13eb   :  { %1826 = vmatprep.subr.bf16.mxu1 %v2056_v0 }
0x13ee   :  { %1827 = vmatpush3.bf16.msra.mxu1 %v2326_v13 }
0x13ef   :  { %1840 = vmatprep.subr.bf16.mxu1 %v2056_v0 }
0x144f   :  { %v2344_v16 = vpop.f32.mrb[20].mxu0 }
0x1450   :  { %v896_v17 = vpop.f32.mrb[21].mxu0 }
0x1451   :  { %v2346_v18 = vpop.f32.mrb[22].mxu0  ;;  %v897_v25 = vadd.f32 %v2355_v24, %v896_v17 }
0x1452   :  { %v2348_v8 = vpop.f32.mrb[23].mxu0 }
0x1453   :  { %v900_v63 = vadd.f32 %v2355_v24, %v2348_v8 }
0x14b4   :  { %v774_v19 = vpop.f32.mrb[16].mxu1 }
0x14b5   :  { %v780_v20 = vadd.f32 %v774_v19, %v175_v6  ;;  %v1802_v21 = vpop.f32.mrb[17].mxu1 }
0x14b6   :  { %v777_v22 = vpop.f32.mrb[18].mxu1 }
0x14b7   :  { %v1803_v2 = vpop.f32.mrb[19].mxu1  ;;  %v1630_v37 = vmul.f32 -1.442695, %v780_v20 }
0x14bc   :  { %v973_v26 = vpop.f32.mrb[20].mxu1 }
0x14bd   :  { %v979_v27 = vadd.f32 %v973_v26, %v897_v25  ;;  %v1822_v5 = vpop.f32.mrb[21].mxu1 }
0x14be   :  { %v976_v28 = vpop.f32.mrb[22].mxu1 }
0x14bf   :  { %v1641_v60 = vmul.f32 -1.442695, %v979_v27  ;;  %v1823_v29 = vpop.f32.mrb[23].mxu1 }
0x14c1   :  { %1951 = vpow2.f32 %v1641_v60 }
0x14cb   :  { %v1952_v7 = vpop.eup %1951 }
0x14cc   :  { %v983_v59 = vadd.f32 1.0, %v1952_v7 }
0x14ce   :  { %1953 = vrcp.f32 %v983_v59 }
0x14cf   :  { %1955 = vpow2.f32 %v1630_v37  ;;  %v905_v37 = vadd.f32 %v2344_v16, %v2355_v24 }
0x14d8   :  { %v1954_v30 = vpop.eup %1953 }
0x14d9   :  { %v986_v32 = vmul.f32 2.0, %v1954_v30  ;;  %v1956_v38 = vpop.eup %1955  ;;  %v988_v40 = vmul.f32 0.0, %v1954_v30 }
0x14da   :  { %v784_v39 = vadd.f32 1.0, %v1956_v38 }
0x14db   :  { %v1642_v33 = vadd.f32 -1.0, %v986_v32 }
0x14dc   :  { %1957 = vrcp.f32 %v784_v39 }
0x14dd   :  { %990 = vrot.lane.b32.xlu0 %v1642_v33, %s2054_s19 }
0x14e6   :  { %v1958_v42 = vpop.eup %1957 }
0x14e7   :  { %v787_v43 = vmul.f32 2.0, %v1958_v42  ;;  %v789_v53 = vmul.f32 %v1958_v42, %v2290_v52 }
0x14e9   :  { %v1631_v46 = vadd.f32 -1.0, %v787_v43 }
0x154f   :  { %v991_v35 = vpop.permute.xlu0 %990 }
0x1550   :  { %v993_v36 = vmul.f32 %v1954_v30, %v991_v35 }
0x1552   :  { %995 = vrot.lane.b32.xlu1 %v993_v36, %s2059_s3 }
0x15c4   :  { %v996_v11 = vpop.permute.xlu1 %995 }
0x15c5   :  { %v998_v41 = vadd.f32 %v996_v11, %v988_v40 }
0x15c7   :  { %1959 = vtanh.f32 %v998_v41 }
0x15d1   :  { %v1960_v44 = vpop.eup %1959 }
0x15d2   :  { %1001 = vrot.lane.b32.xlu0 %v1960_v44, %s2054_s19 }
0x15d6   :  { %791 = vrot.lane.b32.xlu0 %v1631_v46, %s2054_s19 }
0x1644   :  { %v1002_v47 = vpop.permute.xlu0 %1001 }
0x1645   :  { %v1004_v48 = vmul.f32 %v1954_v30, %v1002_v47 }
0x1647   :  { %v1005_v49 = vpack.c.bf16 %v1004_v48, %v1004_v48 }
0x1648   :  { %v792_v50 = vpop.permute.xlu0 %791 }
0x1649   :  { %v794_v57 = vmul.f32 %v1958_v42, %v792_v50  ;;  %1007 = vrot.lane.b32.xlu1 %v1005_v49, %s2059_s3 }
0x164b   :  { %796 = vrot.lane.b32.xlu0 %v794_v57, %s2059_s3 }
0x16bb   :  { %v1008_v51 = vpop.permute.xlu1 %1007 }
0x16bc   :  { %1829 = vmatmul.mubr.msk.bf16.vlgmr.msra.gmra.mrb[24].mxu1 %vm190_vm2, %v1008_v51 }
0x16bd   :  { %v797_v54 = vpop.permute.xlu0 %796  ;;  %1841 = vmatpush3.bf16.msra.mxu1 %v2318_v12  ;;  %1844 = vmatprep.mubr.msk.bf16.mxu1 %vm2057_vm0, %v2056_v0 }
0x16be   :  { %v799_v56 = vadd.f32 %v797_v54, %v789_v53  ;;  %1842 = vmatprep.subr.bf16.mxu1 %v2056_v0 }
0x16c0   :  { %1961 = vtanh.f32 %v799_v56 }
0x16c1   :  { %1843 = vmatpush3.bf16.msra.mxu1 %v2326_v13 }
0x16c2   :  { %1856 = vmatprep.subr.bf16.mxu1 %v2056_v0 }
0x16ca   :  { %v1962_v31 = vpop.eup %1961 }
0x16cb   :  { %802 = vrot.lane.b32.xlu0 %v1962_v31, %s2054_s19 }
0x16cf   :  { %573 = vrot.lane.b32.xlu0 %v2259_v14, %s2059_s3 }
0x16d3   :  { %729 = vrot.lane.b32.xlu0 %v2307_v62, %s2059_s3 }
0x173d   :  { %v803_v52 = vpop.permute.xlu0 %802 }
0x173e   :  { %v805_v22 = vmul.f32 %v1958_v42, %v803_v52 }
0x1741   :  { %v574_v23 = vpop.permute.xlu0 %573 }
0x1742   :  { %576 = vst.msk [vmem:[#allocation2 + $0x20] sm:$0xff] %vm190_vm2, %v574_v23  ;;  %v908_v23 = vadd.f32 %v2346_v18, %v2355_v24 }
0x1745   :  { %v730_v61 = vpop.permute.xlu0 %729 }
0x1746   :  { %732 = vst.msk [vmem:[#allocation2 + $0x30] sm:$0xff] %vm190_vm2, %v730_v61 }
0x1749   :  { %v824_v28 = vld [vmem:[#allocation2 + $0x20] sm:$0xff] }
0x178f   :  { %v1046_v1 = vpop.f32.mrb[24].mxu1 }
0x1790   :  { %v1052_v3 = vadd.f32 %v1046_v1, %v900_v63  ;;  %v1830_v4 = vpop.f32.mrb[25].mxu1 }
0x1791   :  { %v1049_v58 = vpop.f32.mrb[26].mxu1 }
0x1792   :  { %v1644_v55 = vmul.f32 -1.442695, %v1052_v3  ;;  %v1831_v45 = vpop.f32.mrb[27].mxu1 }
0x1794   :  { %1963 = vpow2.f32 %v1644_v55 }
0x179e   :  { %v1964_v14 = vpop.eup %1963 }
0x179f   :  { %v1056_v9 = vadd.f32 1.0, %v1964_v14 }
0x17a1   :  { %1965 = vrcp.f32 %v1056_v9 }
0x17ab   :  { %v1966_v62 = vpop.eup %1965 }
0x17ac   :  { %v1059_v10 = vmul.f32 2.0, %v1966_v62  ;;  %v1061_v8 = vmul.f32 %v1966_v62, %v998_v41 }
0x17ae   :  { %v1645_v15 = vadd.f32 -1.0, %v1059_v10 }
0x17b0   :  { %1063 = vrot.lane.b32.xlu1 %v1645_v15, %s2054_s19 }
0x1822   :  { %v1064_v17 = vpop.permute.xlu1 %1063 }
0x1823   :  { %v1066_v6 = vmul.f32 %v1966_v62, %v1064_v17 }
0x1825   :  { %1068 = vrot.lane.b32.xlu1 %v1066_v6, %s2059_s3 }
0x1897   :  { %v1069_v19 = vpop.permute.xlu1 %1068 }
0x1898   :  { %v1071_v20 = vadd.f32 %v1069_v19, %v1061_v8 }
0x189a   :  { %1967 = vtanh.f32 %v1071_v20 }
0x18a4   :  { %v1968_v21 = vpop.eup %1967 }
0x18a5   :  { %1074 = vrot.lane.b32.xlu1 %v1968_v21, %s2054_s19 }
0x18a9   :  { %651 = vrot.lane.b32.xlu1 %v2276_v34, %s2059_s3  ;;  %v826_v34 = vld [vmem:[#allocation2 + $0x30] sm:$0xff] }
0x18ad   :  { %807 = vrot.lane.b32.xlu1 %v805_v22, %s2059_s3 }
0x1917   :  { %v1075_v2 = vpop.permute.xlu1 %1074 }
0x1918   :  { %v1077_v25 = vmul.f32 %v1966_v62, %v1075_v2 }
0x191a   :  { %v1078_v26 = vpack.c.bf16 %v1077_v25, %v1077_v25 }
0x191b   :  { %v652_v27 = vpop.permute.xlu1 %651 }
0x191c   :  { %654 = vst.msk [vmem:[#allocation2 + $0x28] sm:$0xff] %vm190_vm2, %v652_v27  ;;  %1080 = vrot.lane.b32.xlu0 %v1078_v26, %s2059_s3 }
0x191f   :  { %v808_v5 = vpop.permute.xlu1 %807 }
0x1920   :  { %810 = vst.msk [vmem:[#allocation2 + $0x38] sm:$0xff] %vm190_vm2, %v808_v5 }
0x1923   :  { %v825_v60 = vld [vmem:[#allocation2 + $0x28] sm:$0xff] }
0x1924   :  { %v830_v29 = vpack.c.bf16 %v825_v60, %v824_v28 }
0x1926   :  { %1812 = vmatprep.mubr.msk.bf16.mxu0 %vm190_vm2, %v830_v29 }
0x1927   :  { %v827_v7 = vld [vmem:[#allocation2 + $0x38] sm:$0xff] }
0x1928   :  { %v831_v59 = vpack.c.bf16 %v827_v7, %v826_v34 }
0x192a   :  { %1813 = vmatmul.mubr.msk.bf16.gmra.mrb[24].mxu0 %vm190_vm2, %v831_v59 }
0x192b   :  { %1836 = vmatprep.mubr.msk.bf16.mxu0 %vm2057_vm0, %v2056_v0 }
0x198e   :  { %v1081_v30 = vpop.permute.xlu0 %1080 }
0x198f   :  { %1837 = vmatmul.mubr.msk.bf16.vlgmr.msra.gmra.mrb[28].mxu0 %vm190_vm2, %v1081_v30 }
0x1990   :  { %1849 = vmatpush3.bf16.msra.mxu0 %v2318_v12  ;;  %1852 = vmatprep.mubr.msk.bf16.mxu0 %vm2057_vm0, %v2056_v0 }
0x1991   :  { %1850 = vmatprep.subr.bf16.mxu0 %v2056_v0 }
0x1994   :  { %1851 = vmatpush3.bf16.msra.mxu0 %v2326_v13 }
0x1995   :  { %1864 = vmatprep.subr.bf16.mxu0 %v2056_v0 }
0x19fd   :  { %v2401_v32 = vpop.f32.mrb[24].mxu0 }
0x19fe   :  { %v2403_v33 = vpop.f32.mrb[25].mxu0 }
0x19ff   :  { %v2405_v35 = vpop.f32.mrb[26].mxu0  ;;  %v913_v2 = vadd.f32 %v2355_v24, %v2403_v33 }
0x1a00   :  { %v2407_v36 = vpop.f32.mrb[27].mxu0 }
0x1a62   :  { %v1119_v38 = vpop.f32.mrb[28].mxu0 }
0x1a63   :  { %v1125_v39 = vadd.f32 %v1119_v38, %v905_v37  ;;  %v1838_v40 = vpop.f32.mrb[29].mxu0 }
0x1a64   :  { %v1122_v11 = vpop.f32.mrb[30].mxu0 }
0x1a65   :  { %v1647_v41 = vmul.f32 -1.442695, %v1125_v39  ;;  %v1839_v42 = vpop.f32.mrb[31].mxu0 }
0x1a67   :  { %1969 = vpow2.f32 %v1647_v41 }
0x1a71   :  { %v1970_v43 = vpop.eup %1969 }
0x1a72   :  { %v1129_v44 = vadd.f32 1.0, %v1970_v43 }
0x1a74   :  { %1971 = vrcp.f32 %v1129_v44 }
0x1a7e   :  { %v1972_v46 = vpop.eup %1971 }
0x1a7f   :  { %v1132_v47 = vmul.f32 2.0, %v1972_v46  ;;  %v1134_v16 = vmul.f32 %v1972_v46, %v1071_v20 }
0x1a81   :  { %v1648_v48 = vadd.f32 -1.0, %v1132_v47 }
0x1a83   :  { %1136 = vrot.lane.b32.xlu1 %v1648_v48, %s2054_s19 }
0x1af5   :  { %v1137_v49 = vpop.permute.xlu1 %1136 }
0x1af6   :  { %v1139_v50 = vmul.f32 %v1972_v46, %v1137_v49 }
0x1af8   :  { %1141 = vrot.lane.b32.xlu0 %v1139_v50, %s2059_s3 }
0x1b6a   :  { %v1142_v57 = vpop.permute.xlu0 %1141 }
0x1b6b   :  { %v1144_v51 = vadd.f32 %v1142_v57, %v1134_v16 }
0x1b6d   :  { %1973 = vtanh.f32 %v1144_v51 }
0x1b77   :  { %v1974_v53 = vpop.eup %1973 }
0x1b78   :  { %1147 = vrot.lane.b32.xlu1 %v1974_v53, %s2054_s19 }
0x1bea   :  { %v1148_v54 = vpop.permute.xlu1 %1147 }
0x1beb   :  { %v1150_v56 = vmul.f32 %v1972_v46, %v1148_v54  ;;  %v916_v46 = vadd.f32 %v2355_v24, %v2407_v36 }
0x1bed   :  { %v1151_v31 = vpack.c.bf16 %v1150_v56, %v1150_v56 }
0x1bef   :  { %1153 = vrot.lane.b32.xlu0 %v1151_v31, %s2059_s3 }
0x1c61   :  { %v1154_v52 = vpop.permute.xlu0 %1153 }
0x1c62   :  { %1845 = vmatmul.mubr.msk.bf16.vlgmr.msra.gmra.mrb[28].mxu1 %vm190_vm2, %v1154_v52 }
0x1c63   :  { %1857 = vmatpush3.bf16.msra.mxu1 %v2318_v12  ;;  %1860 = vmatprep.mubr.msk.bf16.mxu1 %vm2057_vm0, %v2056_v0 }
0x1c64   :  { %1858 = vmatprep.subr.bf16.mxu1 %v2056_v0 }
0x1c67   :  { %1859 = vmatpush3.bf16.msra.mxu1 %v2326_v13 }
0x1c68   :  { %1872 = vmatprep.subr.bf16.mxu1 %v2056_v0 }
0x1d35   :  { %v1192_v61 = vpop.f32.mrb[28].mxu1 }
0x1d36   :  { %v1198_v63 = vadd.f32 %v1192_v61, %v908_v23  ;;  %v1846_v1 = vpop.f32.mrb[29].mxu1 }
0x1d37   :  { %v1195_v3 = vpop.f32.mrb[30].mxu1 }
0x1d38   :  { %v1650_v4 = vmul.f32 -1.442695, %v1198_v63  ;;  %v1847_v58 = vpop.f32.mrb[31].mxu1 }
0x1d39   :  { %v921_v58 = vadd.f32 %v2401_v32, %v2355_v24 }
0x1d3a   :  { %1975 = vpow2.f32 %v1650_v4 }
0x1d44   :  { %v1976_v55 = vpop.eup %1975 }
0x1d45   :  { %v1202_v45 = vadd.f32 1.0, %v1976_v55 }
0x1d47   :  { %1977 = vrcp.f32 %v1202_v45 }
0x1d51   :  { %v1978_v14 = vpop.eup %1977 }
0x1d52   :  { %v1205_v9 = vmul.f32 2.0, %v1978_v14  ;;  %v1207_v18 = vmul.f32 %v1978_v14, %v1144_v51 }
0x1d54   :  { %v1651_v62 = vadd.f32 -1.0, %v1205_v9 }
0x1d56   :  { %1209 = vrot.lane.b32.xlu1 %v1651_v62, %s2054_s19 }
0x1dc8   :  { %v1210_v10 = vpop.permute.xlu1 %1209 }
0x1dc9   :  { %v1212_v15 = vmul.f32 %v1978_v14, %v1210_v10 }
0x1dcb   :  { %1214 = vrot.lane.b32.xlu0 %v1212_v15, %s2059_s3 }
0x1e3d   :  { %v1215_v17 = vpop.permute.xlu0 %1214 }
0x1e3e   :  { %v1217_v6 = vadd.f32 %v1215_v17, %v1207_v18 }
0x1e40   :  { %1979 = vtanh.f32 %v1217_v6 }
0x1e4a   :  { %v1980_v8 = vpop.eup %1979 }
0x1e4b   :  { %1220 = vrot.lane.b32.xlu1 %v1980_v8, %s2054_s19 }
0x1ebd   :  { %v1221_v19 = vpop.permute.xlu1 %1220 }
0x1ebe   :  { %v1223_v20 = vmul.f32 %v1978_v14, %v1221_v19 }
0x1ec0   :  { %v1224_v21 = vpack.c.bf16 %v1223_v20, %v1223_v20 }
0x1ec2   :  { %1226 = vrot.lane.b32.xlu0 %v1224_v21, %s2059_s3 }
0x1f34   :  { %v1227_v22 = vpop.permute.xlu0 %1226 }
0x1f35   :  { %1853 = vmatmul.mubr.msk.bf16.vlgmr.msra.gmra.mrb[32].mxu0 %vm190_vm2, %v1227_v22 }
0x1f36   :  { %1865 = vmatpush3.bf16.msra.mxu0 %v2318_v12  ;;  %1868 = vmatprep.mubr.msk.bf16.mxu0 %vm2057_vm0, %v2056_v0 }
0x1f37   :  { %1866 = vmatprep.subr.bf16.mxu0 %v2056_v0 }
0x1f3a   :  { %1867 = vmatpush3.bf16.msra.mxu0 %v2326_v13 }
0x1f3b   :  { %1880 = vmatprep.subr.bf16.mxu0 %v2056_v0 }
0x2008   :  { %v1265_v25 = vpop.f32.mrb[32].mxu0 }
0x2009   :  { %v1271_v26 = vadd.f32 %v1265_v25, %v913_v2  ;;  %v1854_v27 = vpop.f32.mrb[33].mxu0 }
0x200a   :  { %v1268_v5 = vpop.f32.mrb[34].mxu0 }
0x200b   :  { %v1653_v28 = vmul.f32 -1.442695, %v1271_v26  ;;  %v1855_v60 = vpop.f32.mrb[35].mxu0 }
0x200d   :  { %1981 = vpow2.f32 %v1653_v28  ;;  %v924_v28 = vadd.f32 %v2405_v35, %v2355_v24 }
0x2017   :  { %v1982_v29 = vpop.eup %1981 }
0x2018   :  { %v1275_v34 = vadd.f32 1.0, %v1982_v29 }
0x201a   :  { %1983 = vrcp.f32 %v1275_v34 }
0x2024   :  { %v1984_v7 = vpop.eup %1983 }
0x2025   :  { %v1278_v59 = vmul.f32 2.0, %v1984_v7  ;;  %v1280_v33 = vmul.f32 %v1984_v7, %v1217_v6 }
0x2027   :  { %v1654_v30 = vadd.f32 -1.0, %v1278_v59 }
0x2029   :  { %1282 = vrot.lane.b32.xlu1 %v1654_v30, %s2054_s19 }
0x209b   :  { %v1283_v37 = vpop.permute.xlu1 %1282 }
0x209c   :  { %v1285_v38 = vmul.f32 %v1984_v7, %v1283_v37 }
0x209e   :  { %1287 = vrot.lane.b32.xlu0 %v1285_v38, %s2059_s3 }
0x2110   :  { %v1288_v39 = vpop.permute.xlu0 %1287 }
0x2111   :  { %v1290_v40 = vadd.f32 %v1288_v39, %v1280_v33 }
0x2113   :  { %1985 = vtanh.f32 %v1290_v40 }
0x211d   :  { %v1986_v11 = vpop.eup %1985 }
0x211e   :  { %1293 = vrot.lane.b32.xlu1 %v1986_v11, %s2054_s19 }
0x2190   :  { %v1294_v41 = vpop.permute.xlu1 %1293 }
0x2191   :  { %v1296_v42 = vmul.f32 %v1984_v7, %v1294_v41 }
0x2193   :  { %v1297_v43 = vpack.c.bf16 %v1296_v42, %v1296_v42 }
0x2195   :  { %1299 = vrot.lane.b32.xlu0 %v1297_v43, %s2059_s3  ;;  %v1907_v43 = vld [vmem:[%s2499_s7] sm:$0xff]  }
0x2207   :  { %v1300_v44 = vpop.permute.xlu0 %1299 }
0x2208   :  { %1861 = vmatmul.mubr.msk.bf16.vlgmr.msra.gmra.mrb[32].mxu1 %vm190_vm2, %v1300_v44  ;;  %v1908_v44 = vld [vmem:[%s2499_s7 + $0x8] sm:$0xff]   ;;  %s1588_s7 = sshll.u32 %s2060_s1, 4  ;;  %s1589_s7 = int_to_ptr.vmem [resolvable:$true] %s1588_s7 }
0x2209   :  { %1873 = vmatpush3.bf16.msra.mxu1 %v2318_v12  ;;  %1876 = vmatprep.mubr.msk.bf16.mxu1 %vm2057_vm0, %v2056_v0  ;;  %p2032_p9 = scmp.lt.s32.totalorder %s1589_s7, %s1589_s7 }
0x220a   :  { %1874 = vmatprep.subr.bf16.mxu1 %v2056_v0 }
0x220d   :  { %1875 = vmatpush3.bf16.msra.mxu1 %v2326_v13 }
0x22db   :  { %v1338_v47 = vpop.f32.mrb[32].mxu1 }
0x22dc   :  { %v1344_v48 = vadd.f32 %v1338_v47, %v916_v46  ;;  %v1862_v49 = vpop.f32.mrb[33].mxu1 }
0x22dd   :  { %v1341_v50 = vpop.f32.mrb[34].mxu1 }
0x22de   :  { %v1656_v16 = vmul.f32 -1.442695, %v1344_v48  ;;  %v1863_v57 = vpop.f32.mrb[35].mxu1 }
0x22e0   :  { %1987 = vpow2.f32 %v1656_v16  ;;  %v1664_v16 = vld [vmem:[%s2500_s8] ss:$0 sm:$0xff] }
0x22ea   :  { %v1988_v51 = vpop.eup %1987 }
0x22eb   :  { %v1348_v53 = vadd.f32 1.0, %v1988_v51 }
0x22ed   :  { %1989 = vrcp.f32 %v1348_v53 }
0x22f7   :  { %v1990_v12 = vpop.eup %1989 }
0x22f8   :  { %v1351_v54 = vmul.f32 2.0, %v1990_v12  ;;  %v1353_v36 = vmul.f32 %v1990_v12, %v1290_v40 }
0x22fa   :  { %v1657_v56 = vadd.f32 -1.0, %v1351_v54 }
0x22fc   :  { %1355 = vrot.lane.b32.xlu1 %v1657_v56, %s2054_s19 }
0x236e   :  { %v1356_v31 = vpop.permute.xlu1 %1355 }
0x236f   :  { %v1358_v13 = vmul.f32 %v1990_v12, %v1356_v31 }
0x2371   :  { %1360 = vrot.lane.b32.xlu0 %v1358_v13, %s2059_s3 }
0x23e3   :  { %v1361_v52 = vpop.permute.xlu0 %1360 }
0x23e4   :  { %v1363_v23 = vadd.f32 %v1361_v52, %v1353_v36 }
0x23e6   :  { %1991 = vtanh.f32 %v1363_v23 }
0x23f0   :  { %v1992_v61 = vpop.eup %1991 }
0x23f1   :  { %1366 = vrot.lane.b32.xlu1 %v1992_v61, %s2054_s19 }
0x2463   :  { %v1367_v63 = vpop.permute.xlu1 %1366 }
0x2464   :  { %v1369_v1 = vmul.f32 %v1990_v12, %v1367_v63 }
0x2466   :  { %v1370_v3 = vpack.c.bf16 %v1369_v1, %v1369_v1 }
0x2468   :  { %1372 = vrot.lane.b32.xlu0 %v1370_v3, %s2059_s3 }
0x24da   :  { %v1373_v4 = vpop.permute.xlu0 %1372 }
0x24db   :  { %1869 = vmatmul.mubr.msk.bf16.vlgmr.msra.gmra.mrb[36].mxu0 %vm190_vm2, %v1373_v4 }
0x24dc   :  { %1884 = vmatprep.mubr.msk.bf16.mxu0 %vm2057_vm0, %v2056_v0  ;;  %1881 = vmatpush3.bf16.msra.mxu0 %v1907_v43 }
0x24dd   :  { %1882 = vmatprep.subr.bf16.mxu0 %v2056_v0 }
0x24e0   :  { %1883 = vmatpush3.bf16.msra.mxu0 %v1908_v44 }
0x25ae   :  { %v1411_v55 = vpop.f32.mrb[36].mxu0 }
0x25af   :  { %v1417_v45 = vadd.f32 %v1411_v55, %v921_v58  ;;  %v1870_v14 = vpop.f32.mrb[37].mxu0 }
0x25b0   :  { %v1414_v9 = vpop.f32.mrb[38].mxu0 }
0x25b1   :  { %v1659_v62 = vmul.f32 -1.442695, %v1417_v45  ;;  %v1871_v10 = vpop.f32.mrb[39].mxu0 }
0x25b3   :  { %1993 = vpow2.f32 %v1659_v62 }
0x25bd   :  { %v1994_v15 = vpop.eup %1993 }
0x25be   :  { %v1421_v18 = vadd.f32 1.0, %v1994_v15 }
0x25c0   :  { %1995 = vrcp.f32 %v1421_v18 }
0x25ca   :  { %v1996_v17 = vpop.eup %1995 }
0x25cb   :  { %v1424_v6 = vmul.f32 2.0, %v1996_v17  ;;  %v1426_v32 = vmul.f32 %v1996_v17, %v1363_v23 }
0x25cd   :  { %v1660_v8 = vadd.f32 -1.0, %v1424_v6 }
0x25cf   :  { %1428 = vrot.lane.b32.xlu1 %v1660_v8, %s2054_s19 }
0x2641   :  { %v1429_v19 = vpop.permute.xlu1 %1428 }
0x2642   :  { %v1431_v20 = vmul.f32 %v1996_v17, %v1429_v19 }
0x2644   :  { %1433 = vrot.lane.b32.xlu0 %v1431_v20, %s2059_s3 }
0x26b6   :  { %v1434_v21 = vpop.permute.xlu0 %1433 }
0x26b7   :  { %v1436_v22 = vadd.f32 %v1434_v21, %v1426_v32 }
0x26b9   :  { %1997 = vtanh.f32 %v1436_v22 }
0x26c3   :  { %v1998_v2 = vpop.eup %1997 }
0x26c4   :  { %1439 = vrot.lane.b32.xlu1 %v1998_v2, %s2054_s19 }
0x2736   :  { %v1440_v25 = vpop.permute.xlu1 %1439 }
0x2737   :  { %v1442_v26 = vmul.f32 %v1996_v17, %v1440_v25 }
0x2739   :  { %v1443_v27 = vpack.c.bf16 %v1442_v26, %v1442_v26 }
0x273b   :  { %1445 = vrot.lane.b32.xlu0 %v1443_v27, %s2059_s3 }
0x27ad   :  { %v1446_v5 = vpop.permute.xlu0 %1445 }
0x27ae   :  { %1877 = vmatmul.mubr.msk.bf16.vlgmr.msra.gmra.mrb[36].mxu1 %vm190_vm2, %v1446_v5 }
0x2881   :  { %v1484_v60 = vpop.f32.mrb[36].mxu1 }
0x2882   :  { %v1490_v29 = vadd.f32 %v1484_v60, %v924_v28  ;;  %v1878_v34 = vpop.f32.mrb[37].mxu1 }
0x2883   :  { %v1487_v7 = vpop.f32.mrb[38].mxu1 }
0x2884   :  { %v1662_v59 = vmul.f32 -1.442695, %v1490_v29  ;;  %v1879_v30 = vpop.f32.mrb[39].mxu1 }
0x2886   :  { %1999 = vpow2.f32 %v1662_v59 }
0x2890   :  { %v2000_v37 = vpop.eup %1999 }
0x2891   :  { %v1494_v38 = vadd.f32 1.0, %v2000_v37 }
0x2893   :  { %2001 = vrcp.f32 %v1494_v38 }
0x289d   :  { %v2002_v33 = vpop.eup %2001 }
0x289e   :  { %v1497_v39 = vmul.f32 2.0, %v2002_v33  ;;  %v1499_v24 = vmul.f32 %v2002_v33, %v1436_v22 }
0x28a0   :  { %v1663_v40 = vadd.f32 -1.0, %v1497_v39 }
0x28a2   :  { %1501 = vrot.lane.b32.xlu1 %v1663_v40, %s2054_s19 }
0x2914   :  { %v1502_v11 = vpop.permute.xlu1 %1501 }
0x2915   :  { %v1504_v41 = vmul.f32 %v2002_v33, %v1502_v11 }
0x2917   :  { %1506 = vrot.lane.b32.xlu0 %v1504_v41, %s2059_s3 }
0x2989   :  { %v1507_v35 = vpop.permute.xlu0 %1506 }
0x298a   :  { %v1509_v42 = vadd.f32 %v1507_v35, %v1499_v24 }
0x298c   :  { %2003 = vtanh.f32 %v1509_v42 }
0x2996   :  { %v2004_v46 = vpop.eup %2003 }
0x2997   :  { %1512 = vrot.lane.b32.xlu1 %v2004_v46, %s2054_s19  ;;  %s2027_s19 = scalar_lea.vmem %s1589_s7, 128 }
0x2998   :  { %p2028_p8 = scmp.ne.s32.totalorder %s1589_s7, %s2027_s19  ;;  %p2033_p10 = scmp.lt.s32.totalorder %s2027_s19, %s2027_s19 }
0x299a   :  { %p2034_p11 = por %p2033_p10, %p2032_p9 }
0x299c   :  { %p2035_p12 = pnand %p2034_p11, %p2028_p8 }
0x2a09   :  { %v1513_v47 = vpop.permute.xlu1 %1512 }
0x2a0a   :  { %v1515_v48 = vmul.f32 %v2002_v33, %v1513_v47 }
0x2a0c   :  { %v1516_v49 = vpack.c.bf16 %v1515_v48, %v1515_v48 }
0x2a0e   :  { %1524 = vrot.lane.b32.xlu0 %v1516_v49, %s2059_s3 }
0x2a80   :  { %v1525_v50 = vpop.permute.xlu0 %1524 }
0x2a81   :  { %1885 = vmatmul.mubr.msk.bf16.vlgmr.msra.gmra.mrb[40].mxu0 %vm190_vm2, %v1525_v50 }
0x2b54   :  { %v1575_v57 = vpop.f32.mrb[40].mxu0 }
0x2b55   :  { %v1576_v0 = vadd.f32 %v1664_v16, %v1575_v57  ;;  %v1886_v51 = vpop.f32.mrb[41].mxu0 }
0x2b56   :  { %v1578_v53 = vpop.f32.mrb[42].mxu0 }
0x2b57   :  { %1581 = vst [vmem:[#allocation6] sm:$0xff] %v1576_v0  ;;  %v1887_v12 = vpop.f32.mrb[43].mxu0 }
0x2b58   :  { %2038 = shalt.err (!%p2035_p12)
}
0x2b59   :  { %s2039_s8 = scalar_lea.hbm %s2501_s9, 128 }
0x2b5a   :  { %p2040_p13 = scmp.ne.s32.totalorder %s2501_s9, %s2039_s8  ;;  %p2043_p0 = scmp.lt.u32.totalorder %s2039_s8, %s2501_s9 }
0x2b5c   :  { %p2045_p1 = pnand %p2043_p0, %p2040_p13 }
0x2b5e   :  { %2048 = shalt.err (!%p2045_p1)
}
0x2b5f   :  { %1591 = dma.vmem_to_hbm [thread:$0]  %s1589_s7, 128, %s2501_s9, [#allocation5]  }
0x2b60   :  { %2051 = dma.done.wait [#allocation5], 128  }
0x2b61   :  { %2052 = vsyncadd [#allocation5], 4294967168 }
0x2b62   :  { %1595 = vsyncpa [#allocation4], 1 }
0x2b63   :  { %1596 = vsyncpa [#allocation5], 1 }

</bundles_post_ra>
